<compile_context>
chip_gen: v7x
topology: tpu7x:2x2x1
jax: 0.10.0
libtpu: 0.0.40
codegen_flags: <defaults>
</compile_context>

<pallas_src>
import functools

import jax
import jax.numpy as jnp
import numpy as np
from jax.experimental import pallas as pl
from jax.experimental.pallas import tpu as pltpu

EPS = 1e-5
LANE = 128


def _round_up(n, m):
    return ((n + m - 1) // m) * m


def _nbytes(arrs):
    return int(sum(int(np.prod(a.shape)) * a.dtype.itemsize for a in arrs))


def _vmem_limit_bytes():
    """Generation-aware VMEM ceiling: ~70% of physical VMEM, capped at 100 MiB."""
    try:
        cap = int(pltpu.get_tpu_info().vmem_capacity_bytes)
        return max(32 * 1024 * 1024, min(cap * 7 // 10, 100 * 1024 * 1024))
    except Exception:
        return 48 * 1024 * 1024          # safe everywhere (below v7x's 64 MiB)


# ---------------------------------------------------------------------------
# In-kernel helpers
# ---------------------------------------------------------------------------
def _shift_w(x, dw):
    """result[:, w, :] = x[:, w + dw, :]; zero outside [0, W).  XLU roll + mask."""
    if dw == 0:
        return x
    W = x.shape[1]
    rolled = pltpu.roll(x, shift=(-dw) % W, axis=1)
    col = jax.lax.broadcasted_iota(jnp.int32, x.shape, 1)
    mask = (col < W - dw) if dw > 0 else (col >= -dw)
    return jnp.where(mask, rolled, 0.0)


def _shift_h(x, dh):
    """result[h, :, :] = x[h + dh, :, :]; zero outside [0, H) (quarter planes only)."""
    if dh == 0:
        return x
    zeros = jnp.zeros((abs(dh),) + x.shape[1:], x.dtype)
    if dh > 0:
        return jnp.concatenate([x[dh:], zeros], axis=0)
    return jnp.concatenate([zeros, x[:dh]], axis=0)


def _split_rows(x):
    """(H, W, C) -> (even rows, odd rows), each (H//2, W, C)."""
    H, W, C = x.shape
    xr = x.reshape(H // 2, 2, W, C)
    return xr[:, 0], xr[:, 1]


def _dw_conv_s1(ypad_ref, w_all, h, ksize):
    """Stride-1 depthwise KxK conv; H-taps are pl.ds loads from an H-padded scratch."""
    pad = ksize // 2
    _, wdim, cdim = ypad_ref.shape
    acc = jnp.zeros((h, wdim, cdim), jnp.float32)
    for kh in range(ksize):
        yh = ypad_ref[pl.ds(kh, h)]                      # rows shifted by kh - pad (halo = 0)
        for kw in range(ksize):
            idx = kh * ksize + kw
            acc = acc + _shift_w(yh, kw - pad) * w_all[idx:idx + 1]
    return acc


def _dw_conv_s2(planes, w_all, ksize):
    """Stride-2 depthwise KxK conv computed directly at (H/2, W/2) resolution.

    planes[(rp, cp)][i, j, c] = y[2*i + rp, 2*j + cp, c]  (row/col parity planes)
    """
    pad = ksize // 2
    Ho, Wo, C = planes[(0, 0)].shape
    acc = jnp.zeros((Ho, Wo, C), jnp.float32)
    for kw in range(ksize):
        d = kw - pad
        cp, ac = d % 2, (d - d % 2) // 2
        col_shifted = {rp: _shift_w(planes[(rp, cp)], ac) for rp in (0, 1)}
        for kh in range(ksize):
            e = kh - pad
            rp, ar = e % 2, (e - e % 2) // 2
            idx = kh * ksize + kw
            acc = acc + _shift_h(col_shifted[rp], ar) * w_all[idx:idx + 1]
    return acc


# ---------------------------------------------------------------------------
# Fused kernels (one per stride case)
# ---------------------------------------------------------------------------
def _block_s1_kernel(x_ref, w1_ref, b1_ref, wdw_ref, w3_ref, b3_ref,
                     o_ref, ypad_ref, *, ksize, h, w):
    """stride=1 main branch: 1x1(+BN folded)+ReLU -> dwKxK -> 1x1(+BN folded)+ReLU."""
    Cm = w1_ref.shape[1]
    Cout = w3_ref.shape[1]
    pad = ksize // 2

    # pw1 on the MXU (bf16 in, f32 acc); BN1 scale folded into w1, bias+ReLU here.
    y = jnp.dot(x_ref[0], w1_ref[...], preferred_element_type=jnp.float32)
    y = jnp.maximum(y + b1_ref[...], 0.0)

    # Write y into the H-padded scratch (halo rows zeroed once per step).
    zrow = jnp.zeros((pad, w, Cm), jnp.float32)
    ypad_ref[pl.ds(0, pad)] = zrow
    ypad_ref[pl.ds(h + pad, pad)] = zrow
    ypad_ref[pl.ds(pad, h)] = y.reshape(h, w, Cm)

    w_all = wdw_ref[...]                                 # hoisted tap weights (k*k, Cm)
    acc = _dw_conv_s1(ypad_ref, w_all, h, ksize)

    # pw2; BN2+BN3 scales folded into w3, combined bias + ReLU here.
    z = jnp.dot(acc.reshape(h * w, Cm).astype(jnp.bfloat16), w3_ref[...],
                preferred_element_type=jnp.float32)
    z = jnp.maximum(z + b3_ref[...], 0.0)
    o_ref[...] = z.reshape(1, h, w, Cout)                # lane-dense (Cout = mult of 128)


def _block_s2_kernel(x_ref, w1_ref, b1_ref, wdwm_ref, w3_ref, b3_ref,
                     wdwp_ref, w2_ref, b2_ref, op_ref, om_ref, *, ksize, h, wo):
    """stride=2: proj branch and main branch, both computed at H/2 x W/2."""
    Cin = x_ref.shape[-1]
    Cm = w1_ref.shape[1]
    Cout_m = w3_ref.shape[1]
    Cpr = w2_ref.shape[1]
    ho = h // 2

    xflat = x_ref[0]                                     # (2*h*wo, Cin) bf16
    # rows [0, h*wo): even columns of x; rows [h*wo, 2*h*wo): odd columns.

    # ---- main branch: one fused pw1 matmul over both column parities --------
    y = jnp.dot(xflat, w1_ref[...], preferred_element_type=jnp.float32)
    y = jnp.maximum(y + b1_ref[...], 0.0).reshape(2 * h, wo, Cm)
    y_ee, y_oe = _split_rows(y[:h])                      # even columns
    y_eo, y_oo = _split_rows(y[h:])                      # odd columns
    acc_m = _dw_conv_s2({(0, 0): y_ee, (1, 0): y_oe, (0, 1): y_eo, (1, 1): y_oo},
                        wdwm_ref[...], ksize)
    z_m = jnp.dot(acc_m.reshape(ho * wo, Cm).astype(jnp.bfloat16), w3_ref[...],
                  preferred_element_type=jnp.float32)
    z_m = jnp.maximum(z_m + b3_ref[...], 0.0)
    om_ref[...] = z_m.reshape(1, ho, wo, Cout_m)         # lane-dense store

    # ---- projection branch ---------------------------------------------------
    xf = xflat.astype(jnp.float32).reshape(2 * h, wo, Cin)
    x_ee, x_oe = _split_rows(xf[:h])
    x_eo, x_oo = _split_rows(xf[h:])
    acc_p = _dw_conv_s2({(0, 0): x_ee, (1, 0): x_oe, (0, 1): x_eo, (1, 1): x_oo},
                        wdwp_ref[...], ksize)
    z_p = jnp.dot(acc_p.reshape(ho * wo, Cin).astype(jnp.bfloat16), w2_ref[...],
                  preferred_element_type=jnp.float32)
    z_p = jnp.maximum(z_p + b2_ref[...], 0.0)
    op_ref[...] = z_p.reshape(1, ho, wo, Cpr)            # lane-dense store


# ---------------------------------------------------------------------------
# pallas_call wrappers
# ---------------------------------------------------------------------------
def _bcast_spec(shape):
    zeros = (0,) * len(shape)
    return pl.BlockSpec(shape, lambda n, _z=zeros: _z)


def _block_s1_pallas(x_main, pm, ksize, H, W):
    N, HW, Cin = x_main.shape
    Cm_p = pm["w1"].shape[1]
    Cout_p = pm["w3"].shape[1]
    pad = ksize // 2
    args = (x_main, pm["w1"], pm["b1"], pm["wdw"], pm["w3"], pm["b3"])
    in_specs = ([pl.BlockSpec((1, HW, Cin), lambda n: (n, 0, 0))]
                + [_bcast_spec(a.shape) for a in args[1:]])
    flops = 2 * N * HW * (Cin * Cm_p + ksize * ksize * Cm_p + Cm_p * Cout_p)
    bytes_accessed = _nbytes(args) + 4 * N * HW * Cout_p
    return pl.pallas_call(
        functools.partial(_block_s1_kernel, ksize=ksize, h=H, w=W),
        out_shape=jax.ShapeDtypeStruct((N, H, W, Cout_p), jnp.float32),
        grid=(N,),
        in_specs=in_specs,
        out_specs=pl.BlockSpec((1, H, W, Cout_p), lambda n: (n, 0, 0, 0)),
        scratch_shapes=[pltpu.VMEM((H + 2 * pad, W, Cm_p), jnp.float32)],
        compiler_params=pltpu.CompilerParams(
            dimension_semantics=("parallel",),
            vmem_limit_bytes=_vmem_limit_bytes()),
        cost_estimate=pl.CostEstimate(flops=flops, transcendentals=0,
                                      bytes_accessed=bytes_accessed),
    )(*args)


def _block_s2_pallas(x_par, pm, pp, ksize, H, Wo):
    N, M, Cin = x_par.shape                              # M = 2*H*Wo
    Ho = H // 2
    Cm_p = pm["w1"].shape[1]
    Cout_p = pm["w3"].shape[1]
    Cpr_p = pp["w2"].shape[1]
    args = (x_par, pm["w1"], pm["b1"], pm["wdw"], pm["w3"], pm["b3"],
            pp["wdw"], pp["w2"], pp["b2"])
    in_specs = ([pl.BlockSpec((1, M, Cin), lambda n: (n, 0, 0))]
                + [_bcast_spec(a.shape) for a in args[1:]])
    flops = 2 * N * (M * Cin * Cm_p
                     + Ho * Wo * (ksize * ksize * Cm_p + Cm_p * Cout_p
                                  + ksize * ksize * Cin + Cin * Cpr_p))
    bytes_accessed = _nbytes(args) + 4 * N * Ho * Wo * (Cpr_p + Cout_p)
    return pl.pallas_call(
        functools.partial(_block_s2_kernel, ksize=ksize, h=H, wo=Wo),
        out_shape=(jax.ShapeDtypeStruct((N, Ho, Wo, Cpr_p), jnp.float32),
                   jax.ShapeDtypeStruct((N, Ho, Wo, Cout_p), jnp.float32)),
        grid=(N,),
        in_specs=in_specs,
        out_specs=(pl.BlockSpec((1, Ho, Wo, Cpr_p), lambda n: (n, 0, 0, 0)),
                   pl.BlockSpec((1, Ho, Wo, Cout_p), lambda n: (n, 0, 0, 0))),
        compiler_params=pltpu.CompilerParams(
            dimension_semantics=("parallel",),
            vmem_limit_bytes=_vmem_limit_bytes()),
        cost_estimate=pl.CostEstimate(flops=flops, transcendentals=0,
                                      bytes_accessed=bytes_accessed),
    )(*args)


# ---------------------------------------------------------------------------
# Parameters (deterministic, PyTorch-shaped), BN folding, channel padding
# ---------------------------------------------------------------------------
def _bn_init(key, c):
    k1, k2, k3, k4 = jax.random.split(key, 4)
    return dict(
        gamma=1.0 + 0.1 * jax.random.normal(k1, (c,), jnp.float32),
        beta=0.1 * jax.random.normal(k2, (c,), jnp.float32),
        mean=0.1 * jax.random.normal(k3, (c,), jnp.float32),
        var=jax.random.uniform(k4, (c,), jnp.float32, 0.5, 1.5),
    )


def _fold_bn(bn):
    scale = bn["gamma"] / jnp.sqrt(bn["var"] + EPS)
    bias = bn["beta"] - bn["mean"] * scale
    return scale, bias


def _pad_last(a, n):
    p = n - a.shape[-1]
    return a if p == 0 else jnp.pad(a, [(0, 0)] * (a.ndim - 1) + [(0, p)])


def _pad_first(a, n):
    p = n - a.shape[0]
    return a if p == 0 else jnp.pad(a, [(0, p)] + [(0, 0)] * (a.ndim - 1))


def init_shuffle_block_params(key, inp, oup, mid_channels, ksize, stride):
    outputs = oup - inp
    ks = jax.random.split(key, 10)
    params = dict(
        main=dict(
            w1=0.2 * jax.random.normal(ks[0], (mid_channels, inp, 1, 1), jnp.float32),
            bn1=_bn_init(ks[1], mid_channels),
            wdw=0.2 * jax.random.normal(ks[2], (mid_channels, 1, ksize, ksize), jnp.float32),
            bn2=_bn_init(ks[3], mid_channels),
            w3=0.2 * jax.random.normal(ks[4], (outputs, mid_channels, 1, 1), jnp.float32),
            bn3=_bn_init(ks[5], outputs),
        ),
        proj=None,
    )
    if stride == 2:
        params["proj"] = dict(
            wdw=0.2 * jax.random.normal(ks[6], (inp, 1, ksize, ksize), jnp.float32),
            bn1=_bn_init(ks[7], inp),
            w2=0.2 * jax.random.normal(ks[8], (inp, inp, 1, 1), jnp.float32),
            bn2=_bn_init(ks[9], inp),
        )
    return params


def _kernelize_main(p):
    """Fold BN into the 1x1 weights (in f32), pad channel dims to LANE, cast bf16."""
    s1, b1 = _fold_bn(p["bn1"])
    s2, b2 = _fold_bn(p["bn2"])
    s3, b3 = _fold_bn(p["bn3"])
    w1 = jnp.transpose(p["w1"][:, :, 0, 0])                    # (Cin, Cm)
    w3 = jnp.transpose(p["w3"][:, :, 0, 0])                    # (Cm, Cout)
    Cm, Cout = w1.shape[1], w3.shape[1]
    ksq = p["wdw"].shape[2] * p["wdw"].shape[3]
    wdw = jnp.transpose(p["wdw"][:, 0].reshape(Cm, ksq))       # (k*k, Cm)
    Cm_p, Cout_p = _round_up(Cm, LANE), _round_up(Cout, LANE)

    w1f = w1 * s1[None, :]                                     # BN1 scale folded (exact)
    w3f = (s2[:, None] * w3) * s3[None, :]                     # BN2+BN3 scales folded
    b3f = (b2 @ w3) * s3 + b3                                  # BN2 bias pushed through w3

    return dict(
        w1=_pad_last(w1f, Cm_p).astype(jnp.bfloat16),
        b1=_pad_last(b1.reshape(1, -1), Cm_p),
        wdw=_pad_last(wdw, Cm_p),
        w3=_pad_last(_pad_first(w3f, Cm_p), Cout_p).astype(jnp.bfloat16),
        b3=_pad_last(b3f.reshape(1, -1), Cout_p),
        cout=Cout,
    )


def _kernelize_proj(p):
    s1, b1 = _fold_bn(p["bn1"])
    s2, b2 = _fold_bn(p["bn2"])
    inp = p["wdw"].shape[0]
    ksq = p["wdw"].shape[2] * p["wdw"].shape[3]
    wdw = jnp.transpose(p["wdw"][:, 0].reshape(inp, ksq))      # (k*k, inp)
    w2 = jnp.transpose(p["w2"][:, :, 0, 0])                    # (inp, inp)
    Cpr_p = _round_up(inp, LANE)
    w2f = (s1[:, None] * w2) * s2[None, :]
    b2f = (b1 @ w2) * s2 + b2
    return dict(
        wdw=wdw,
        w2=_pad_last(w2f, Cpr_p).astype(jnp.bfloat16),
        b2=_pad_last(b2f.reshape(1, -1), Cpr_p),
        cout=inp,
    )


def channel_shuffle(x):
    """Exact replica of ShuffleV2Block.channel_shuffle (NCHW input)."""
    b, c, h, w = x.shape
    assert c % 4 == 0
    x = x.reshape(b * c // 2, 2, h * w)
    x = jnp.transpose(x, (1, 0, 2))
    x = x.reshape(2, -1, c // 2, h, w)
    return x[0], x[1]


def shuffle_v2_block_pallas(x, params, *, ksize, stride):
    """Forward pass of ShuffleV2Block. x is NCHW, returns NCHW (matches PyTorch)."""
    assert stride in (1, 2)
    pm = _kernelize_main(params["main"])
    N, C, H, W = x.shape
    x_nhwc = jnp.transpose(x, (0, 2, 3, 1))

    if stride == 1:
        # channel_shuffle(x): proj = even channels (pure copy, assembled by the
        # XLA fusion below), main = odd channels (kernel input, bf16).
        x_main = x_nhwc[..., 1::2].reshape(N, H * W, C // 2).astype(jnp.bfloat16)
        z = _block_s1_pallas(x_main, pm, ksize, H, W)          # (N,H,W,Cout_p) f32
        z_nchw = jnp.transpose(z[..., :pm["cout"]], (0, 3, 1, 2))
        return jnp.concatenate([x[:, 0::2], z_nchw], axis=1)

    assert H % 2 == 0 and W % 2 == 0, "stride-2 needs even H, W"
    pp = _kernelize_proj(params["proj"])
    Wo = W // 2
    # Column-parity split (even columns stacked on top of odd columns) lets the
    # fused kernel compute both branches directly at W/2 resolution.
    x_par = jnp.concatenate([x_nhwc[:, :, 0::2, :], x_nhwc[:, :, 1::2, :]], axis=1)
    x_par = x_par.reshape(N, 2 * H * Wo, C).astype(jnp.bfloat16)
    z_p, z_m = _block_s2_pallas(x_par, pm, pp, ksize, H, Wo)
    out_nhwc = jnp.concatenate([z_p[..., :pp["cout"]], z_m[..., :pm["cout"]]], axis=-1)
    return jnp.transpose(out_nhwc, (0, 3, 1, 2))


# ---------------------------------------------------------------------------
# Pure-JAX reference (mirrors the PyTorch module, eval-mode BN, f32 HIGHEST)
# ---------------------------------------------------------------------------
def _conv_ref(x, w, stride=1, pad=0, groups=1):
    return jax.lax.conv_general_dilated(
        x, w, window_strides=(stride, stride), padding=[(pad, pad), (pad, pad)],
        dimension_numbers=("NCHW", "OIHW", "NCHW"), feature_group_count=groups,
        precision=jax.lax.Precision.HIGHEST)


def _bn_ref(x, bn):
    scale = bn["gamma"] / jnp.sqrt(bn["var"] + EPS)
    bias = bn["beta"] - bn["mean"] * scale
    return x * scale[None, :, None, None] + bias[None, :, None, None]


def shuffle_v2_block_ref(x, params, *, ksize, stride):
    pad = ksize // 2
    pm = params["main"]
    mid = pm["w1"].shape[0]

    def branch_main(z):
        z = jax.nn.relu(_bn_ref(_conv_ref(z, pm["w1"]), pm["bn1"]))
        z = _bn_ref(_conv_ref(z, pm["wdw"], stride=stride, pad=pad, groups=mid), pm["bn2"])
        z = jax.nn.relu(_bn_ref(_conv_ref(z, pm["w3"]), pm["bn3"]))
        return z

    if stride == 1:
        x_proj, x_main = channel_shuffle(x)
        return jnp.concatenate([x_proj, branch_main(x_main)], axis=1)

    pp = params["proj"]
    inp = pp["wdw"].shape[0]
    z = _bn_ref(_conv_ref(x, pp["wdw"], stride=stride, pad=pad, groups=inp), pp["bn1"])
    z = jax.nn.relu(_bn_ref(_conv_ref(z, pp["w2"]), pp["bn2"]))
    return jnp.concatenate([z, branch_main(x)], axis=1)


# ---------------------------------------------------------------------------
if __name__ == "__main__":
    key = jax.random.PRNGKey(0)
    kx1, kp1, kx2, kp2 = jax.random.split(key, 4)

    # bf16 activation I/O + bf16 (BN-folded) 1x1 weights with f32 accumulation,
    # compared against an f32 HIGHEST reference -> ~1e-3 typical error.
    RTOL = ATOL = 1.5e-2

    # stride=1 block: forward input has 2*inp channels (channel shuffle splits it).
    inp, oup, mid, ksize = 4, 8, 8, 3
    x1 = jax.random.normal(kx1, (2, 2 * inp, 16, 16), jnp.float32)
    p1 = init_shuffle_block_params(kp1, inp, oup, mid, ksize, stride=1)
    out1 = jax.block_until_ready(shuffle_v2_block_pallas(x1, p1, ksize=ksize, stride=1))
    ref1 = shuffle_v2_block_ref(x1, p1, ksize=ksize, stride=1)
    assert out1.shape == (2, oup, 16, 16)
    np.testing.assert_allclose(np.asarray(out1), np.asarray(ref1), rtol=RTOL, atol=ATOL)

    # stride=2 block: forward input has inp channels, spatial downsampled by 2.
    inp2, oup2, mid2 = 4, 12, 8
    x2 = jax.random.normal(kx2, (2, inp2, 16, 16), jnp.float32)
    p2 = init_shuffle_block_params(kp2, inp2, oup2, mid2, ksize, stride=2)
    out2 = jax.block_until_ready(shuffle_v2_block_pallas(x2, p2, ksize=ksize, stride=2))
    ref2 = shuffle_v2_block_ref(x2, p2, ksize=ksize, stride=2)
    assert out2.shape == (2, oup2, 8, 8)
    np.testing.assert_allclose(np.asarray(out2), np.asarray(ref2), rtol=RTOL, atol=ATOL)

    print("KERNEL_OK")
</pallas_src>

<mosaic_0001>
module attributes {stable_mosaic.version = 11 : i64} {
  func.func @_block_s1_kernel(%arg0: i32, %arg1: memref<1x256x4xbf16, #tpu.memory_space<vmem>>, %arg2: memref<4x128xbf16, #tpu.memory_space<vmem>>, %arg3: memref<1x128xf32, #tpu.memory_space<vmem>>, %arg4: memref<9x128xf32, #tpu.memory_space<vmem>>, %arg5: memref<128x128xbf16, #tpu.memory_space<vmem>>, %arg6: memref<1x128xf32, #tpu.memory_space<vmem>>, %arg7: memref<1x16x16x128xf32, #tpu.memory_space<vmem>>, %arg8: memref<18x16x128xf32, #tpu.memory_space<vmem>>) attributes {dimension_semantics = [#tpu.dimension_semantics<parallel>], iteration_bounds = array<i64: 2>, scalar_prefetch = 0 : i64, scratch_operands = 1 : i64, tpu.core_type = #tpu.core_type<tc>, window_params = [{transform_indices = @transform_0, window_bounds = array<i64: 1, 256, 4>}, {pipeline_mode = #tpu.pipeline_mode<synchronous>, transform_indices = @transform_1, window_bounds = array<i64: 4, 128>}, {pipeline_mode = #tpu.pipeline_mode<synchronous>, transform_indices = @transform_2, window_bounds = array<i64: 1, 128>}, {pipeline_mode = #tpu.pipeline_mode<synchronous>, transform_indices = @transform_3, window_bounds = array<i64: 9, 128>}, {pipeline_mode = #tpu.pipeline_mode<synchronous>, transform_indices = @transform_4, window_bounds = array<i64: 128, 128>}, {pipeline_mode = #tpu.pipeline_mode<synchronous>, transform_indices = @transform_5, window_bounds = array<i64: 1, 128>}, {transform_indices = @transform_6, window_bounds = array<i64: 1, 16, 16, 128>}]} {
    %c0 = arith.constant 0 : index
    %c0_0 = arith.constant 0 : index
    %c0_1 = arith.constant 0 : index
    %0 = vector.load %arg1[%c0, %c0_0, %c0_1] : memref<1x256x4xbf16, #tpu.memory_space<vmem>>, vector<1x256x4xbf16>
    %1 = vector.shape_cast %0 : vector<1x256x4xbf16> to vector<256x4xbf16>
    %c0_2 = arith.constant 0 : index
    %c0_3 = arith.constant 0 : index
    %2 = vector.load %arg2[%c0_2, %c0_3] : memref<4x128xbf16, #tpu.memory_space<vmem>>, vector<4x128xbf16>
    %cst = arith.constant dense<0.000000e+00> : vector<256x128xf32>
    %3 = tpu.matmul %1, %2, %cst {dimension_numbers = #tpu.dot_dimension_numbers<[1], [0], [0], [1], [0, 0, 1, 1], [], []>} : vector<256x4xbf16>, vector<4x128xbf16>, vector<256x128xf32> -> vector<256x128xf32>
    %c0_4 = arith.constant 0 : index
    %c0_5 = arith.constant 0 : index
    %4 = vector.load %arg3[%c0_4, %c0_5] : memref<1x128xf32, #tpu.memory_space<vmem>>, vector<1x128xf32>
    %5 = vector.broadcast %4 : vector<1x128xf32> to vector<256x128xf32>
    %6 = arith.addf %3, %5 : vector<256x128xf32>
    %cst_6 = arith.constant 0.000000e+00 : f32
    %7 = vector.broadcast %cst_6 : f32 to vector<256x128xf32>
    %8 = arith.maximumf %6, %7 : vector<256x128xf32>
    %cst_7 = arith.constant 0.000000e+00 : f32
    %9 = vector.broadcast %cst_7 : f32 to vector<1x16x128xf32>
    %c0_8 = arith.constant 0 : index
    %c0_9 = arith.constant 0 : index
    %c0_10 = arith.constant 0 : index
    %10 = vector.load %arg8[%c0_8, %c0_9, %c0_10] : memref<18x16x128xf32, #tpu.memory_space<vmem>>, vector<1x16x128xf32>
    tpu.vector_store %arg8[%c0_8, %c0_9, %c0_10], %9 {strides = array<i32>} : memref<18x16x128xf32, #tpu.memory_space<vmem>>, vector<1x16x128xf32>,
    %c17 = arith.constant 17 : index
    %c0_11 = arith.constant 0 : index
    %c0_12 = arith.constant 0 : index
    %11 = vector.load %arg8[%c17, %c0_11, %c0_12] : memref<18x16x128xf32, #tpu.memory_space<vmem>>, vector<1x16x128xf32>
    tpu.vector_store %arg8[%c17, %c0_11, %c0_12], %9 {strides = array<i32>} : memref<18x16x128xf32, #tpu.memory_space<vmem>>, vector<1x16x128xf32>,
    %12 = vector.shape_cast %8 : vector<256x128xf32> to vector<16x16x128xf32>
    %c1 = arith.constant 1 : index
    %c0_13 = arith.constant 0 : index
    %c0_14 = arith.constant 0 : index
    %13 = vector.load %arg8[%c1, %c0_13, %c0_14] : memref<18x16x128xf32, #tpu.memory_space<vmem>>, vector<16x16x128xf32>
    tpu.vector_store %arg8[%c1, %c0_13, %c0_14], %12 {strides = array<i32>} : memref<18x16x128xf32, #tpu.memory_space<vmem>>, vector<16x16x128xf32>,
    %c0_15 = arith.constant 0 : index
    %c0_16 = arith.constant 0 : index
    %14 = vector.load %arg4[%c0_15, %c0_16] : memref<9x128xf32, #tpu.memory_space<vmem>>, vector<9x128xf32>
    %cst_17 = arith.constant 0.000000e+00 : f32
    %15 = vector.broadcast %cst_17 : f32 to vector<16x16x128xf32>
    %c0_18 = arith.constant 0 : index
    %c0_19 = arith.constant 0 : index
    %c0_20 = arith.constant 0 : index
    %16 = vector.load %arg8[%c0_18, %c0_19, %c0_20] : memref<18x16x128xf32, #tpu.memory_space<vmem>>, vector<16x16x128xf32>
    %c1_i32 = arith.constant 1 : i32
    %17 = tpu.dynamic_rotate %16 by %c1_i32 dim 1 : vector<16x16x128xf32>, i32 -> vector<16x16x128xf32>
    %18 = tpu.iota {dimensions = array<i32: 1>} : vector<16x16x128xi32>
    %c1_i32_21 = arith.constant 1 : i32
    %19 = vector.broadcast %c1_i32_21 : i32 to vector<16x16x128xi32>
    %20 = arith.cmpi sge, %18, %19 : vector<16x16x128xi32>
    %cst_22 = arith.constant 0.000000e+00 : f32
    %21 = vector.broadcast %cst_22 : f32 to vector<16x16x128xf32>
    %22 = arith.select %20, %17, %21 : vector<16x16x128xi1>, vector<16x16x128xf32>
    %23 = vector.extract_strided_slice %14 {offsets = [0, 0], sizes = [1, 128], strides = [1, 1]} : vector<9x128xf32> to vector<1x128xf32>
    %24 = vector.shape_cast %23 : vector<1x128xf32> to vector<1x1x128xf32>
    %25 = vector.broadcast %24 : vector<1x1x128xf32> to vector<16x16x128xf32>
    %26 = arith.mulf %22, %25 : vector<16x16x128xf32>
    %27 = arith.addf %15, %26 : vector<16x16x128xf32>
    %28 = vector.extract_strided_slice %14 {offsets = [1, 0], sizes = [1, 128], strides = [1, 1]} : vector<9x128xf32> to vector<1x128xf32>
    %29 = vector.shape_cast %28 : vector<1x128xf32> to vector<1x1x128xf32>
    %30 = vector.broadcast %29 : vector<1x1x128xf32> to vector<16x16x128xf32>
    %31 = arith.mulf %16, %30 : vector<16x16x128xf32>
    %32 = arith.addf %27, %31 : vector<16x16x128xf32>
    %c15_i32 = arith.constant 15 : i32
    %33 = tpu.dynamic_rotate %16 by %c15_i32 dim 1 : vector<16x16x128xf32>, i32 -> vector<16x16x128xf32>
    %34 = tpu.iota {dimensions = array<i32: 1>} : vector<16x16x128xi32>
    %c15_i32_23 = arith.constant 15 : i32
    %35 = vector.broadcast %c15_i32_23 : i32 to vector<16x16x128xi32>
    %36 = arith.cmpi slt, %34, %35 : vector<16x16x128xi32>
    %cst_24 = arith.constant 0.000000e+00 : f32
    %37 = vector.broadcast %cst_24 : f32 to vector<16x16x128xf32>
    %38 = arith.select %36, %33, %37 : vector<16x16x128xi1>, vector<16x16x128xf32>
    %39 = vector.extract_strided_slice %14 {offsets = [2, 0], sizes = [1, 128], strides = [1, 1]} : vector<9x128xf32> to vector<1x128xf32>
    %40 = vector.shape_cast %39 : vector<1x128xf32> to vector<1x1x128xf32>
    %41 = vector.broadcast %40 : vector<1x1x128xf32> to vector<16x16x128xf32>
    %42 = arith.mulf %38, %41 : vector<16x16x128xf32>
    %43 = arith.addf %32, %42 : vector<16x16x128xf32>
    %c1_25 = arith.constant 1 : index
    %c0_26 = arith.constant 0 : index
    %c0_27 = arith.constant 0 : index
    %44 = vector.load %arg8[%c1_25, %c0_26, %c0_27] : memref<18x16x128xf32, #tpu.memory_space<vmem>>, vector<16x16x128xf32>
    %c1_i32_28 = arith.constant 1 : i32
    %45 = tpu.dynamic_rotate %44 by %c1_i32_28 dim 1 : vector<16x16x128xf32>, i32 -> vector<16x16x128xf32>
    %46 = tpu.iota {dimensions = array<i32: 1>} : vector<16x16x128xi32>
    %c1_i32_29 = arith.constant 1 : i32
    %47 = vector.broadcast %c1_i32_29 : i32 to vector<16x16x128xi32>
    %48 = arith.cmpi sge, %46, %47 : vector<16x16x128xi32>
    %cst_30 = arith.constant 0.000000e+00 : f32
    %49 = vector.broadcast %cst_30 : f32 to vector<16x16x128xf32>
    %50 = arith.select %48, %45, %49 : vector<16x16x128xi1>, vector<16x16x128xf32>
    %51 = vector.extract_strided_slice %14 {offsets = [3, 0], sizes = [1, 128], strides = [1, 1]} : vector<9x128xf32> to vector<1x128xf32>
    %52 = vector.shape_cast %51 : vector<1x128xf32> to vector<1x1x128xf32>
    %53 = vector.broadcast %52 : vector<1x1x128xf32> to vector<16x16x128xf32>
    %54 = arith.mulf %50, %53 : vector<16x16x128xf32>
    %55 = arith.addf %43, %54 : vector<16x16x128xf32>
    %56 = vector.extract_strided_slice %14 {offsets = [4, 0], sizes = [1, 128], strides = [1, 1]} : vector<9x128xf32> to vector<1x128xf32>
    %57 = vector.shape_cast %56 : vector<1x128xf32> to vector<1x1x128xf32>
    %58 = vector.broadcast %57 : vector<1x1x128xf32> to vector<16x16x128xf32>
    %59 = arith.mulf %44, %58 : vector<16x16x128xf32>
    %60 = arith.addf %55, %59 : vector<16x16x128xf32>
    %c15_i32_31 = arith.constant 15 : i32
    %61 = tpu.dynamic_rotate %44 by %c15_i32_31 dim 1 : vector<16x16x128xf32>, i32 -> vector<16x16x128xf32>
    %62 = tpu.iota {dimensions = array<i32: 1>} : vector<16x16x128xi32>
    %c15_i32_32 = arith.constant 15 : i32
    %63 = vector.broadcast %c15_i32_32 : i32 to vector<16x16x128xi32>
    %64 = arith.cmpi slt, %62, %63 : vector<16x16x128xi32>
    %cst_33 = arith.constant 0.000000e+00 : f32
    %65 = vector.broadcast %cst_33 : f32 to vector<16x16x128xf32>
    %66 = arith.select %64, %61, %65 : vector<16x16x128xi1>, vector<16x16x128xf32>
    %67 = vector.extract_strided_slice %14 {offsets = [5, 0], sizes = [1, 128], strides = [1, 1]} : vector<9x128xf32> to vector<1x128xf32>
    %68 = vector.shape_cast %67 : vector<1x128xf32> to vector<1x1x128xf32>
    %69 = vector.broadcast %68 : vector<1x1x128xf32> to vector<16x16x128xf32>
    %70 = arith.mulf %66, %69 : vector<16x16x128xf32>
    %71 = arith.addf %60, %70 : vector<16x16x128xf32>
    %c2 = arith.constant 2 : index
    %c0_34 = arith.constant 0 : index
    %c0_35 = arith.constant 0 : index
    %72 = vector.load %arg8[%c2, %c0_34, %c0_35] : memref<18x16x128xf32, #tpu.memory_space<vmem>>, vector<16x16x128xf32>
    %c1_i32_36 = arith.constant 1 : i32
    %73 = tpu.dynamic_rotate %72 by %c1_i32_36 dim 1 : vector<16x16x128xf32>, i32 -> vector<16x16x128xf32>
    %74 = tpu.iota {dimensions = array<i32: 1>} : vector<16x16x128xi32>
    %c1_i32_37 = arith.constant 1 : i32
    %75 = vector.broadcast %c1_i32_37 : i32 to vector<16x16x128xi32>
    %76 = arith.cmpi sge, %74, %75 : vector<16x16x128xi32>
    %cst_38 = arith.constant 0.000000e+00 : f32
    %77 = vector.broadcast %cst_38 : f32 to vector<16x16x128xf32>
    %78 = arith.select %76, %73, %77 : vector<16x16x128xi1>, vector<16x16x128xf32>
    %79 = vector.extract_strided_slice %14 {offsets = [6, 0], sizes = [1, 128], strides = [1, 1]} : vector<9x128xf32> to vector<1x128xf32>
    %80 = vector.shape_cast %79 : vector<1x128xf32> to vector<1x1x128xf32>
    %81 = vector.broadcast %80 : vector<1x1x128xf32> to vector<16x16x128xf32>
    %82 = arith.mulf %78, %81 : vector<16x16x128xf32>
    %83 = arith.addf %71, %82 : vector<16x16x128xf32>
    %84 = vector.extract_strided_slice %14 {offsets = [7, 0], sizes = [1, 128], strides = [1, 1]} : vector<9x128xf32> to vector<1x128xf32>
    %85 = vector.shape_cast %84 : vector<1x128xf32> to vector<1x1x128xf32>
    %86 = vector.broadcast %85 : vector<1x1x128xf32> to vector<16x16x128xf32>
    %87 = arith.mulf %72, %86 : vector<16x16x128xf32>
    %88 = arith.addf %83, %87 : vector<16x16x128xf32>
    %c15_i32_39 = arith.constant 15 : i32
    %89 = tpu.dynamic_rotate %72 by %c15_i32_39 dim 1 : vector<16x16x128xf32>, i32 -> vector<16x16x128xf32>
    %90 = tpu.iota {dimensions = array<i32: 1>} : vector<16x16x128xi32>
    %c15_i32_40 = arith.constant 15 : i32
    %91 = vector.broadcast %c15_i32_40 : i32 to vector<16x16x128xi32>
    %92 = arith.cmpi slt, %90, %91 : vector<16x16x128xi32>
    %cst_41 = arith.constant 0.000000e+00 : f32
    %93 = vector.broadcast %cst_41 : f32 to vector<16x16x128xf32>
    %94 = arith.select %92, %89, %93 : vector<16x16x128xi1>, vector<16x16x128xf32>
    %95 = vector.extract_strided_slice %14 {offsets = [8, 0], sizes = [1, 128], strides = [1, 1]} : vector<9x128xf32> to vector<1x128xf32>
    %96 = vector.shape_cast %95 : vector<1x128xf32> to vector<1x1x128xf32>
    %97 = vector.broadcast %96 : vector<1x1x128xf32> to vector<16x16x128xf32>
    %98 = arith.mulf %94, %97 : vector<16x16x128xf32>
    %99 = arith.addf %88, %98 : vector<16x16x128xf32>
    %100 = vector.shape_cast %99 : vector<16x16x128xf32> to vector<256x128xf32>
    %101 = arith.truncf %100 : vector<256x128xf32> to vector<256x128xbf16>
    %c0_42 = arith.constant 0 : index
    %c0_43 = arith.constant 0 : index
    %102 = vector.load %arg5[%c0_42, %c0_43] : memref<128x128xbf16, #tpu.memory_space<vmem>>, vector<128x128xbf16>
    %cst_44 = arith.constant dense<0.000000e+00> : vector<256x128xf32>
    %103 = tpu.matmul %101, %102, %cst_44 {dimension_numbers = #tpu.dot_dimension_numbers<[1], [0], [0], [1], [0, 0, 1, 1], [], []>} : vector<256x128xbf16>, vector<128x128xbf16>, vector<256x128xf32> -> vector<256x128xf32>
    %c0_45 = arith.constant 0 : index
    %c0_46 = arith.constant 0 : index
    %104 = vector.load %arg6[%c0_45, %c0_46] : memref<1x128xf32, #tpu.memory_space<vmem>>, vector<1x128xf32>
    %105 = vector.broadcast %104 : vector<1x128xf32> to vector<256x128xf32>
    %106 = arith.addf %103, %105 : vector<256x128xf32>
    %cst_47 = arith.constant 0.000000e+00 : f32
    %107 = vector.broadcast %cst_47 : f32 to vector<256x128xf32>
    %108 = arith.maximumf %106, %107 : vector<256x128xf32>
    %109 = vector.shape_cast %108 : vector<256x128xf32> to vector<1x16x16x128xf32>
    %c0_48 = arith.constant 0 : index
    %c0_49 = arith.constant 0 : index
    %c0_50 = arith.constant 0 : index
    %c0_51 = arith.constant 0 : index
    %110 = vector.load %arg7[%c0_48, %c0_49, %c0_50, %c0_51] : memref<1x16x16x128xf32, #tpu.memory_space<vmem>>, vector<1x16x16x128xf32>
    tpu.vector_store %arg7[%c0_48, %c0_49, %c0_50, %c0_51], %109 {strides = array<i32>} : memref<1x16x16x128xf32, #tpu.memory_space<vmem>>, vector<1x16x16x128xf32>,
    return
  }
  func.func @transform_0(%arg0: i32) -> (i32, i32, i32) {
    %c0_i32 = arith.constant 0 : i32
    %c0_i32_0 = arith.constant 0 : i32
    %c0_i32_1 = arith.constant 0 : i32
    return %arg0, %c0_i32, %c0_i32_0 : i32, i32, i32
  }
  func.func @transform_1(%arg0: i32) -> (i32, i32) {
    %c0_i32 = arith.constant 0 : i32
    %c0_i32_0 = arith.constant 0 : i32
    %c0_i32_1 = arith.constant 0 : i32
    return %c0_i32, %c0_i32_0 : i32, i32
  }
  func.func @transform_2(%arg0: i32) -> (i32, i32) {
    %c0_i32 = arith.constant 0 : i32
    %c0_i32_0 = arith.constant 0 : i32
    %c0_i32_1 = arith.constant 0 : i32
    return %c0_i32, %c0_i32_0 : i32, i32
  }
  func.func @transform_3(%arg0: i32) -> (i32, i32) {
    %c0_i32 = arith.constant 0 : i32
    %c0_i32_0 = arith.constant 0 : i32
    %c0_i32_1 = arith.constant 0 : i32
    return %c0_i32, %c0_i32_0 : i32, i32
  }
  func.func @transform_4(%arg0: i32) -> (i32, i32) {
    %c0_i32 = arith.constant 0 : i32
    %c0_i32_0 = arith.constant 0 : i32
    %c0_i32_1 = arith.constant 0 : i32
    return %c0_i32, %c0_i32_0 : i32, i32
  }
  func.func @transform_5(%arg0: i32) -> (i32, i32) {
    %c0_i32 = arith.constant 0 : i32
    %c0_i32_0 = arith.constant 0 : i32
    %c0_i32_1 = arith.constant 0 : i32
    return %c0_i32, %c0_i32_0 : i32, i32
  }
  func.func @transform_6(%arg0: i32) -> (i32, i32, i32, i32) {
    %c0_i32 = arith.constant 0 : i32
    %c0_i32_0 = arith.constant 0 : i32
    %c0_i32_1 = arith.constant 0 : i32
    %c0_i32_2 = arith.constant 0 : i32
    return %arg0, %c0_i32, %c0_i32_0, %c0_i32_1 : i32, i32, i32, i32
  }
}

</mosaic_0001>

<bundles_post_ra>
// kernel: tpu_custom_call.1
= control target key start
LH: loop header
LB: loop body
LE: loop exit
PB: predicated region body
PF: predicated region fallthrough
CT: control target
= control target key end

     0   :  { %11 = vsyncpa [#allocation4], 0  ;;  %s4331_s0 = inlined_call_operand.vmem [shape: bf16[2,256,4], index: 0, kind: input, shape index: {}]   ;;  %s4332_s1 = inlined_call_operand.vmem [shape: bf16[4,128], index: 1, kind: input, shape index: {}]   ;;  %s4333_s2 = inlined_call_operand.vmem [shape: f32[1,128], index: 2, kind: input, shape index: {}]   ;;  %s4334_s3 = inlined_call_operand.vmem [shape: f32[9,128], index: 3, kind: input, shape index: {}]   ;;  %s4335_s4 = inlined_call_operand.vmem [shape: bf16[128,128], index: 4, kind: input, shape index: {}]   ;;  %s4336_s5 = inlined_call_operand.vmem [shape: f32[1,128], index: 5, kind: input, shape index: {}]   ;;  %s4337_s6 = inlined_call_operand.hbm [shape: f32[2,16,16,128], index: 6, kind: output, shape index: {}]  }
   0x1   :  { %13 = vsyncpa [#allocation4 + $0x1], 0  ;;  %s2707_s21 = smov 0   ;;  %s2709_s22 = smov 0  }
   0x2   :  { %s2711_s23 = smov 0   ;;  %s2713_s24 = smov 0  }
   0x3 LB: > { %s2728_s25 = sadd.s32 4294967295, %s2666_s24   ;;  %s2339_s26 = sadd.s32 4294967294, %s2666_s24   ;;  %s2666_s24 = sphi %s2713_s24, %s4571_s24   ;;  %s2662_s23 = sphi %s2711_s23, %s4570_s23   ;;  %s2658_s22 = sphi %s2709_s22, %s4569_s22   ;;  %s2654_s21 = sphi %s2707_s21, %s4568_s21  }
   0x4   : > { %s2732_s27 = sadd.s32 1, %s2666_s24   ;;  %s157_s28 = sadd.s32 1, %s2662_s23 }
   0x5   : > { %s154_s29 = ssub.s32 %s2666_s24, %s2732_s27  ;;  %p167_p0 = scmp.ne.s32.totalorder %s2662_s23, %s2658_s22 }
   0x6   : > { %p155_p1 = scmp.eq.s32.totalorder %s154_s29, 0  ;;  %p168_p2 = scmp.eq.s32.totalorder %s2728_s25, 1 }
   0x7   : > { %p173_p3 = scmp.ne.s32.totalorder %s2658_s22, %s2654_s21  ;;  %p174_p4 = scmp.eq.s32.totalorder %s2339_s26, 1 }
   0x8   : > { %s2743_s30 = scalar_select %p155_p1, %s2662_s23, %s157_s28  }
   0x9   : > { %p2745_p5 = por %p168_p2, %p167_p0  ;;  %p2749_p6 = por %p174_p4, %p173_p3 }
   0xa   : > { %p2342_p7 = scmp.ge.s32.totalorder %s2666_s24, 1  ;;  %p215_p8 = scmp.lt.s32.totalorder %s2666_s24, 3 }
   0xc   : > { %p216_p9 = pnand %p2342_p7, %p215_p8 }
   0xe   : > { %219 = sbr.rel (%p216_p9) target bundleno = 694 (0x2b6), region = 44 }
  0x15   : > { %v283_v0 = vld [vmem:[%s4332_s1] sm:$0x3]  ;;  %vm420_vm0 = vcmask 1041408   ;;  %p245_p10 = scmp.lt.s32.totalorder %s2728_s25, 1  ;;  %vm371_vm1 = vcmask 31744   ;;  %v2595_v19 = vld [vmem:[%s4335_s4 + $0x8] sm:$0xff]   ;;  %v721_v26 = vlaneseq }
  0x16   : > { %2535 = vmatprep.subr.msk.bf16.mxu0 %vm420_vm0, %v283_v0  ;;  %v422_v1 = vsel %vm420_vm0, %v283_v0, 0  ;;  %v2594_v18 = vld [vmem:[%s4335_s4] sm:$0xff]   ;;  %v2596_v20 = vld [vmem:[%s4335_s4 + $0x10] sm:$0xff]   ;;  %v2597_v21 = vld [vmem:[%s4335_s4 + $0x18] sm:$0xff]   ;;  %v2668_v31 = vmov 0.0   ;;  %s2395_s17 = sshll.u32 %s2728_s25, 12 }
  0x17   : > { %2438 = vmatpush3.bf16.msra.mxu0 %v422_v1  ;;  %s246_s11 = scalar_select %p245_p10, %s2728_s25, 1  ;;  %2519 = vmatprep.subr.bf16.mxu1 %v2594_v18  ;;  %v2598_v22 = vld [vmem:[%s4335_s4 + $0x20] sm:$0xff]   ;;  %v2599_v23 = vld [vmem:[%s4335_s4 + $0x28] sm:$0xff]   ;;  %v2600_v24 = vld [vmem:[%s4335_s4 + $0x30] sm:$0xff]   ;;  %v2821_v27 = vshrl.u32 %v721_v26, 7  ;;  %v2828_v32 = vrot.slane %v2668_v31, 7 }
  0x18   : > { %2471 = vmatprep.subr.bf16.mxu0 %v2594_v18  ;;  %2527 = vmatpush3.bf16.msra.mxu1 %v2594_v18  ;;  %v2601_v25 = vld [vmem:[%s4335_s4 + $0x38] sm:$0xff]   ;;  %v655_v30 = vld [vmem:[%s4334_s3] sm:$0xff]  ;;  %v2839_v37 = vrot.slane %v2668_v31, 1  ;;  %s4281_s26 = scalar_lea.hbm %s4337_s6, %s2395_s17  ;;  %s2669_s29 = smov [#allocation3]  }
  0x19   : > { %s2394_s12 = sshll.u32 %s246_s11, 7  ;;  %2520 = vmatprep.subr.bf16.mxu1 %v2595_v19  ;;  %v793_v28 = vsub.s32 0, %v2821_v27  ;;  %v861_v29 = vsub.s32 1, %v2821_v27  ;;  %4363 = vst [vmem:[#allocation6_spill] sm:$0xff] %v2828_v32  ;;  %v2831_v33 = vadd.s32 8, %v2821_v27  ;;  %vm757_vm2 = vcmp.ge.s32.totalorder %v2821_v27, 1 }
  0x1a   : > { %s2763_s15 = scalar_lea.vmem %s4331_s0, %s2394_s12  ;;  %v1028_v35 = vsub.s32 2, %v2821_v27  ;;  %4364 = vst [vmem:[#allocation7_spill] sm:$0xff] %v2839_v37  ;;  %v2845_v38 = vsel %vm757_vm2, %v2828_v32, 0.0  ;;  %v2853_v41 = vld [vmem:[%s4333_s2] ss:$0 sm:$0xff]  ;;  %v1292_v46 = vsub.s32 4, %v2821_v27 }
  0x1b   : > { %v2578_v2 = vld [vmem:[%s2763_s15] sm:$0xff]   ;;  %v2579_v3 = vld [vmem:[%s2763_s15 + $0x8] sm:$0xff]   ;;  %v2580_v4 = vld [vmem:[%s2763_s15 + $0x10] sm:$0xff]   ;;  %v2834_v34 = vrot.slane %v655_v30, %v793_v28  ;;  %v2837_v36 = vrot.slane %v655_v30, %v861_v29  ;;  %vm993_vm3 = vcmp.lt.s32.totalorder %v2831_v33, 15  ;;  %4365 = vst [vmem:[#allocation8_spill] sm:$0xff] %v2845_v38  ;;  %v1224_v50 = vsub.s32 3, %v2821_v27 }
  0x1c   : > { %2439 = vmatprep.mubr.msk.bf16.mxu0 %vm371_vm1, %v2578_v2  ;;  %v2581_v5 = vld [vmem:[%s2763_s15 + $0x18] sm:$0xff]   ;;  %v2582_v6 = vld [vmem:[%s2763_s15 + $0x20] sm:$0xff]   ;;  %v2583_v7 = vld [vmem:[%s2763_s15 + $0x28] sm:$0xff]   ;;  %2528 = vmatpush3.bf16.msra.mxu1 %v2595_v19  ;;  %v2855_v42 = vrot.slane %v655_v30, %v1028_v35  ;;  %v2860_v43 = vsel %vm993_vm3, %v2839_v37, 0.0  ;;  %v1721_v51 = vsub.s32 7, %v2821_v27  ;;  %v1456_v55 = vsub.s32 5, %v2821_v27 }
  0x1d   : > { %2440 = vmatmul.mubr.msk.bf16.vlgmr.msra.gmra.mrb[0].mxu0 %vm371_vm1, %v2579_v3  ;;  %v2584_v8 = vld [vmem:[%s2763_s15 + $0x30] sm:$0xff]   ;;  %v2585_v9 = vld [vmem:[%s2763_s15 + $0x38] sm:$0xff]   ;;  %v2586_v10 = vld [vmem:[%s2763_s15 + $0x40] sm:$0xff]   ;;  %2521 = vmatprep.subr.bf16.mxu1 %v2596_v20  ;;  %v796_v39 = vmul.f32 %v2834_v34, %v2828_v32  ;;  %v863_v40 = vmul.f32 0.0, %v2837_v36  ;;  %4366 = vst [vmem:[#allocation9_spill] sm:$0xff] %v2860_v43  ;;  %v795_v44 = vmul.f32 %v2834_v34, %v2845_v38  ;;  %v1653_v56 = vsub.s32 6, %v2821_v27 }
  0x1e   : > { %2443 = vmatprep.mubr.msk.bf16.mxu0 %vm371_vm1, %v2580_v4  ;;  %v2587_v11 = vld [vmem:[%s2763_s15 + $0x48] sm:$0xff]   ;;  %v2588_v12 = vld [vmem:[%s2763_s15 + $0x50] sm:$0xff]   ;;  %v2589_v13 = vld [vmem:[%s2763_s15 + $0x58] sm:$0xff]   ;;  %2472 = vmatpush3.bf16.msra.mxu0 %v2594_v18  ;;  %v1031_v54 = vmul.f32 %v2855_v42, %v2860_v43  ;;  %v1030_v61 = vmul.f32 %v2855_v42, %v2839_v37  ;;  %v2878_v62 = vrot.slane %v655_v30, %v1292_v46  ;;  %vm723_vm4 = vcmp.lt.s32.totalorder %v2821_v27, 1  ;;  %s242_s12 = sand.u32 1, %s2658_s22   ;;  %s2608_s9 = sshll.u32 %s2669_s29, 4  ;;  %s2609_s9 = int_to_ptr.vmem [resolvable:$false] %s2608_s9 }
  0x1f   : > { %v2590_v14 = vld [vmem:[%s2763_s15 + $0x60] sm:$0xff]   ;;  %v2591_v15 = vld [vmem:[%s2763_s15 + $0x68] sm:$0xff]   ;;  %v2592_v16 = vld [vmem:[%s2763_s15 + $0x70] sm:$0xff]   ;;  %2473 = vmatprep.subr.bf16.mxu0 %v2595_v19  ;;  %v896_v49 = vadd.f32 %v863_v40, %v796_v39  ;;  %v895_v60 = vadd.f32 %v863_v40, %v795_v44  ;;  %vm959_vm5 = vcmp.lt.s32.totalorder %v2821_v27, 7  ;;  %v2883_v1 = vrot.slane %v655_v30, %v1721_v51  ;;  %s4290_s25 = scalar_lea.sflag [#allocation4], %s242_s12  ;;  %s2610_s10 = scalar_lea.vmem %s2609_s9, 8192 }
  0x20   : > { %v2593_v17 = vld [vmem:[%s2763_s15 + $0x78] sm:$0xff]   ;;  %2529 = vmatpush3.bf16.msra.mxu1 %v2596_v20  ;;  %v2885_v3 = vrot.slane %v655_v30, %v1224_v50  ;;  %v2887_v4 = vrot.slane %v655_v30, %v1456_v55  ;;  %s2343_s15 = sshll.u32 %s242_s12, 8 }
  0x21   : > { %2522 = vmatprep.subr.bf16.mxu1 %v2597_v21  ;;  %v1063_v2 = vadd.f32 %v1031_v54, %v896_v49  ;;  %s4217_s16 = scalar_lea.vmem [#allocation3], %s2343_s15 }
  0x22   : > { %2474 = vmatpush3.bf16.msra.mxu0 %v2595_v19  ;;  %s2277_s18 = sshll.u32 %s4217_s16, 4  ;;  %s4283_s18 = int_to_ptr.vmem [resolvable:$true] %s2277_s18 }
  0x23   : > { %2475 = vmatprep.subr.bf16.mxu0 %v2596_v20  ;;  %s2604_s28 = scalar_lea.vmem %s4283_s18, 4096  ;;  %p2611_p0 = scmp.lt.s32.totalorder %s4283_s18, %s2609_s9 }
  0x24   : > { %2530 = vmatpush3.bf16.msra.mxu1 %v2597_v21  ;;  %p2605_p11 = scmp.ne.s32.totalorder %s4283_s18, %s2604_s28  ;;  %p2612_p1 = scmp.lt.s32.totalorder %s2610_s10, %s2604_s28 }
  0x25   : > { %2444 = vmatmul.mubr.msk.bf16.gmra.mrb[4].mxu0 %vm371_vm1, %v2581_v5  ;;  %2523 = vmatprep.subr.bf16.mxu1 %v2598_v22  ;;  %v2889_v5 = vrot.slane %v655_v30, %v1653_v56 }
  0x26   : > { %2447 = vmatprep.mubr.msk.bf16.mxu0 %vm371_vm1, %v2582_v6  ;;  %2476 = vmatpush3.bf16.msra.mxu0 %v2596_v20  ;;  %p2606_p12 = pnand %p2605_p11, %p2745_p5  ;;  %p2613_p2 = por %p2612_p1, %p2611_p0 }
  0x27   : > { %2477 = vmatprep.subr.bf16.mxu0 %v2597_v21 }
  0x28   : > { %2531 = vmatpush3.bf16.msra.mxu1 %v2598_v22  ;;  %p2607_p13 = pneg %p2606_p12 }
  0x29   : > { %2524 = vmatprep.subr.bf16.mxu1 %v2599_v23 }
  0x2a   : > { %2478 = vmatpush3.bf16.msra.mxu0 %v2597_v21  ;;  %p2614_p3 = pnand %p2613_p2, %p2607_p13 }
  0x2b   : > { %2479 = vmatprep.subr.bf16.mxu0 %v2598_v22 }
  0x2c   : > { %2532 = vmatpush3.bf16.msra.mxu1 %v2599_v23 }
  0x2d   : > { %2448 = vmatmul.mubr.msk.bf16.gmra.mrb[8].mxu0 %vm371_vm1, %v2583_v7  ;;  %2525 = vmatprep.subr.bf16.mxu1 %v2600_v24 }
  0x2e   : > { %2451 = vmatprep.mubr.msk.bf16.mxu0 %vm371_vm1, %v2584_v8  ;;  %2480 = vmatpush3.bf16.msra.mxu0 %v2598_v22 }
  0x2f   : > { %2481 = vmatprep.subr.bf16.mxu0 %v2599_v23 }
  0x30   : > { %2533 = vmatpush3.bf16.msra.mxu1 %v2600_v24 }
  0x31   : > { %2526 = vmatprep.subr.bf16.mxu1 %v2601_v25 }
  0x32   : > { %2482 = vmatpush3.bf16.msra.mxu0 %v2599_v23 }
  0x33   : > { %2483 = vmatprep.subr.bf16.mxu0 %v2600_v24 }
  0x34   : > { %2534 = vmatpush3.bf16.msra.mxu1 %v2601_v25 }
  0x35   : > { %2452 = vmatmul.mubr.msk.bf16.gmra.mrb[12].mxu0 %vm371_vm1, %v2585_v9  ;;  %v2894_v9 = vadd.f32 %v1030_v61, %v895_v60 }
  0x36   : > { %2455 = vmatprep.mubr.msk.bf16.mxu0 %vm371_vm1, %v2586_v10  ;;  %2484 = vmatpush3.bf16.msra.mxu0 %v2600_v24 }
  0x37   : > { %2485 = vmatprep.subr.bf16.mxu0 %v2601_v25 }
  0x3a   : > { %2486 = vmatpush3.bf16.msra.mxu0 %v2601_v25 }
  0x3d   : > { %2456 = vmatmul.mubr.msk.bf16.gmra.mrb[16].mxu0 %vm371_vm1, %v2587_v11 }
  0x3e   : > { %2459 = vmatprep.mubr.msk.bf16.mxu0 %vm371_vm1, %v2588_v12 }
  0x45   : > { %2460 = vmatmul.mubr.msk.bf16.gmra.mrb[20].mxu0 %vm371_vm1, %v2589_v13 }
  0x46   : > { %2463 = vmatprep.mubr.msk.bf16.mxu0 %vm371_vm1, %v2590_v14 }
  0x4d   : > { %2464 = vmatmul.mubr.msk.bf16.gmra.mrb[24].mxu0 %vm371_vm1, %v2591_v15 }
  0x4e   : > { %2467 = vmatprep.mubr.msk.bf16.mxu0 %vm371_vm1, %v2592_v16 }
  0x55   : > { %2468 = vmatmul.mubr.msk.bf16.gmra.mrb[28].mxu0 %vm371_vm1, %v2593_v17 }
  0xf0   : > { %v2441_v45 = vpop.f32.mrb[0].mxu0 }
  0xf1   : > { %v467_v47 = vadd.f32 %v2441_v45, %v2853_v41  ;;  %v458_v48 = vpop.f32.mrb[1].mxu0 }
  0xf2   : > { %v459_v52 = vadd.f32 %v2853_v41, %v458_v48  ;;  %v2442_v53 = vpop.f32.mrb[2].mxu0 }
  0xf3   : > { %v2873_v57 = vmax.f32 %v467_v47, 0.0  ;;  %v470_v58 = vadd.f32 %v2442_v53, %v2853_v41  ;;  %v461_v59 = vpop.f32.mrb[3].mxu0 }
  0xf4   : > { %v585_v63 = vmax.f32 %v459_v52, 0.0  ;;  %v462_v0 = vadd.f32 %v2853_v41, %v461_v59 }
  0xf5   : > { %v691_v6 = vrot.slane %v2873_v57, 7  ;;  %v2892_v7 = vmax.f32 %v470_v58, 0.0  ;;  %v2898_v10 = vmul.f32 %v2837_v36, %v2873_v57  ;;  %v2903_v12 = vmul.f32 %v2878_v62, %v2873_v57 }
  0xf6   : > { %v586_v8 = vmax.f32 %v462_v0, 0.0  ;;  %v690_v13 = vrot.slane %v585_v63, 7  ;;  %v865_v15 = vmul.f32 %v2837_v36, %v585_v63  ;;  %v928_v16 = vrot.slane %v585_v63, 1 }
  0xf7   : > { %v2907_v17 = vmul.f32 %v2878_v62, %v585_v63  ;;  %v707_v18 = vrot.slane %v2892_v7, 7  ;;  %v2912_v20 = vmul.f32 %v2837_v36, %v2892_v7  ;;  %v2916_v24 = vmul.f32 %v2883_v1, %v2873_v57 }
  0xf8   : > { %v2445_v14 = vpop.f32.mrb[4].mxu0  ;;  %v706_v21 = vrot.slane %v586_v8, 7  ;;  %v944_v22 = vrot.slane %v586_v8, 1  ;;  %v866_v25 = vmul.f32 %v2837_v36, %v586_v8  ;;  %v1295_v51 = vmul.f32 %v2878_v62, %v586_v8 }
  0xf9   : > { %v474_v19 = vpop.f32.mrb[5].mxu0  ;;  %v483_v26 = vadd.f32 %v2445_v14, %v2853_v41  ;;  %v2923_v30 = vsel %vm723_vm4, %v691_v6, %v707_v18  ;;  %v742_v61 = vsel %vm723_vm4, %v707_v18, %v691_v6  ;;  %v2960_v0 = vmul.f32 %v2878_v62, %v2892_v7 }
  0xfa   : > { %v2446_v23 = vpop.f32.mrb[6].mxu0  ;;  %v475_v28 = vadd.f32 %v2853_v41, %v474_v19  ;;  %v725_v31 = vsel %vm723_vm4, %v690_v13, %v706_v21  ;;  %v741_v35 = vsel %vm723_vm4, %v706_v21, %v690_v13  ;;  %v2931_v39 = vsel %vm959_vm5, %v928_v16, %v944_v22 }
  0xfb   : > { %v477_v29 = vpop.f32.mrb[7].mxu0  ;;  %v977_v40 = vsel %vm959_vm5, %v944_v22, %v928_v16  ;;  %v761_v44 = vsel %vm757_vm2, %v741_v35, 0.0  ;;  %v798_v45 = vmul.f32 %v2834_v34, %v725_v31  ;;  %v486_v47 = vadd.f32 %v2446_v23, %v2853_v41 }
  0xfc   : > { %v2940_v46 = vsel %vm993_vm3, %v977_v40, 0.0  ;;  %v797_v48 = vmul.f32 %v2834_v34, %v761_v44  ;;  %v1227_v50 = vmul.f32 %v2885_v3, %v725_v31  ;;  %v1032_v53 = vmul.f32 %v2855_v42, %v2931_v39 }
  0xfd   : > { %v1033_v49 = vmul.f32 %v2855_v42, %v2940_v46  ;;  %v898_v52 = vadd.f32 %v866_v25, %v798_v45  ;;  %v2950_v54 = vmax.f32 %v483_v26, 0.0  ;;  %v2952_v55 = vmax.f32 %v475_v28, 0.0 }
  0xfe   : > { %v897_v56 = vadd.f32 %v865_v15, %v797_v48  ;;  %v1259_v58 = vadd.f32 %v1227_v50, %v1063_v2  ;;  %v478_v59 = vadd.f32 %v2853_v41, %v477_v29  ;;  %v2964_v13 = vmax.f32 %v486_v47, 0.0 }
  0xff   : > { %v2962_v8 = vadd.f32 %v1033_v49, %v898_v52  ;;  %v2969_v2 = vmul.f32 %v2885_v3, %v761_v44  ;;  %v2976_v19 = vmul.f32 %v2837_v36, %v2950_v54  ;;  %v2980_v21 = vmul.f32 %v2878_v62, %v2950_v54 }
 0x100   : > { %v2449_v60 = vpop.f32.mrb[8].mxu0  ;;  %v2966_v16 = vadd.f32 %v1032_v53, %v897_v56  ;;  %v2971_v15 = vadd.f32 %v1295_v51, %v1259_v58  ;;  %v692_v22 = vrot.slane %v2952_v55, 7  ;;  %v2985_v23 = vmul.f32 %v2837_v36, %v2952_v55 }
 0x101   : > { %v490_v14 = vpop.f32.mrb[9].mxu0  ;;  %v930_v26 = vrot.slane %v2952_v55, 1  ;;  %v2988_v28 = vmax.f32 %v478_v59, 0.0  ;;  %v499_v29 = vadd.f32 %v2449_v60, %v2853_v41  ;;  %v2994_v35 = vmul.f32 %v2883_v1, %v2952_v55 }
 0x102   : > { %v2450_v18 = vpop.f32.mrb[10].mxu0  ;;  %v491_v31 = vadd.f32 %v2853_v41, %v490_v14  ;;  %v2999_v44 = vmul.f32 %v2837_v36, %v2964_v13  ;;  %v3004_v47 = vmul.f32 %v2878_v62, %v2964_v13  ;;  %v3017_v56 = vsel %vm757_vm2, %v742_v61, 0.0 }
 0x103   : > { %v493_v25 = vpop.f32.mrb[11].mxu0  ;;  %v502_v45 = vadd.f32 %v2450_v18, %v2853_v41  ;;  %v708_v48 = vrot.slane %v2988_v28, 7  ;;  %v946_v49 = vrot.slane %v2988_v28, 1  ;;  %v3009_v51 = vmax.f32 %v499_v29, 0.0 }
 0x104   : > { %v494_v50 = vadd.f32 %v2853_v41, %v493_v25  ;;  %v3011_v52 = vmax.f32 %v491_v31, 0.0  ;;  %v870_v25 = vmul.f32 %v2837_v36, %v2988_v28  ;;  %v3039_v29 = vmul.f32 %v2883_v1, %v2988_v28 }
 0x105   : > { %4367 = vst [vmem:[#allocation10_spill] sm:$0xff] %v3009_v51  ;;  %v3013_v53 = vmax.f32 %v502_v45, 0.0  ;;  %v3021_v58 = vsel %vm723_vm4, %v692_v22, %v708_v48  ;;  %v743_v59 = vsel %vm723_vm4, %v708_v48, %v692_v22  ;;  %v3027_v60 = vsel %vm959_vm5, %v930_v26, %v946_v49 }
 0x106   : > { %v3031_v14 = vsel %vm959_vm5, %v946_v49, %v930_v26  ;;  %v802_v61 = vmul.f32 %v2834_v34, %v3021_v58  ;;  %v3043_v31 = vmul.f32 %v2834_v34, %v2923_v30  ;;  %v3047_v26 = vsel %vm757_vm2, %v743_v59, 0.0 }
 0x107   : > { %4368 = vst [vmem:[#allocation11_spill] sm:$0xff] %v3013_v53  ;;  %v3052_v48 = vmul.f32 %v2837_v36, %v3009_v51  ;;  %v3054_v49 = vmax.f32 %v494_v50, 0.0  ;;  %v3061_v63 = vmul.f32 %v2878_v62, %v3009_v51  ;;  %v3066_v45 = vmul.f32 %v2837_v36, %v3011_v52 }
 0x108   : > { %v2453_v18 = vpop.f32.mrb[12].mxu0  ;;  %v3056_v40 = vadd.f32 %v870_v25, %v802_v61  ;;  %v3071_v50 = vmul.f32 %v2878_v62, %v3011_v52  ;;  %v3076_v25 = vmul.f32 %v2837_v36, %v3013_v53  ;;  %v3081_v59 = vmul.f32 %v2878_v62, %v3013_v53 }
 0x109   : > { %v506_v22 = vpop.f32.mrb[13].mxu0  ;;  %4369 = vst [vmem:[#allocation12_spill] sm:$0xff] %v3052_v48  ;;  %4370 = vst [vmem:[#allocation13_spill] sm:$0xff] %v3061_v63  ;;  %v515_v32 = vadd.f32 %v2453_v18, %v2853_v41  ;;  %v4377_v11 = vrot.slane %v2892_v7, 1 }
 0x10a   : > { %v2454_v6 = vpop.f32.mrb[14].mxu0  ;;  %4371 = vst [vmem:[#allocation14_spill] sm:$0xff] %v3066_v45  ;;  %4372 = vst [vmem:[#allocation15_spill] sm:$0xff] %v3071_v50  ;;  %v507_v38 = vadd.f32 %v2853_v41, %v506_v22  ;;  %v3090_v50 = vmul.f32 %v2837_v36, %v3054_v49 }
 0x10b   : > { %v509_v43 = vpop.f32.mrb[15].mxu0  ;;  %4373 = vst [vmem:[#allocation16_spill] sm:$0xff] %v3076_v25  ;;  %4374 = vst [vmem:[#allocation17_spill] sm:$0xff] %v3081_v59  ;;  %v518_v63 = vadd.f32 %v2454_v6, %v2853_v41  ;;  %v3092_v48 = vmax.f32 %v515_v32, 0.0  ;;  %v4378_v59 = vrot.slane %v2873_v57, 1  ;;  %v4380_v6 = vmov %v4377_v11 }
 0x10c   : > { %v510_v61 = vadd.f32 %v2853_v41, %v509_v43  ;;  %4375 = vst [vmem:[#allocation18_spill] sm:$0xff] %v3090_v50  ;;  %v3111_v32 = vmul.f32 %v2878_v62, %v3054_v49  ;;  %v3113_v25 = vmax.f32 %v507_v38, 0.0  ;;  %v3121_v57 = vmul.f32 %v2834_v34, %v3017_v56 }
 0x10d   : > { %4376 = vst [vmem:[#allocation19_spill] sm:$0xff] %v3092_v48  ;;  %v3100_v18 = vsel %vm959_vm5, %v4378_v59, %v4377_v11  ;;  %v4379_v22 = vmov %v4378_v59  ;;  %v3115_v51 = vmax.f32 %v518_v63, 0.0  ;;  %v3132_v63 = vmul.f32 %v2837_v36, %v3092_v48 }
 0x10e   : > { %v978_v43 = vsel %vm959_vm5, %v4380_v6, %v4379_v22  ;;  %4381 = vst [vmem:[#allocation20_spill] sm:$0xff] %v3111_v32  ;;  %4382 = vst [vmem:[#allocation21_spill] sm:$0xff] %v3113_v25  ;;  %v3117_v11 = vmax.f32 %v510_v61, 0.0  ;;  %v1228_v22 = vmul.f32 %v2885_v3, %v3017_v56  ;;  %v3137_v37 = vmul.f32 %v2878_v62, %v3092_v48 }
 0x10f   : > { %4383 = vst [vmem:[#allocation22_spill] sm:$0xff] %v3115_v51  ;;  %v3125_v59 = vsel %vm993_vm3, %v978_v43, 0.0  ;;  %4385 = vst [vmem:[#allocation24_spill] sm:$0xff] %v3132_v63  ;;  %v3142_v50 = vmul.f32 %v2837_v36, %v3113_v25  ;;  %v3147_v38 = vmul.f32 %v2878_v62, %v3113_v25  ;;  %v3152_v48 = vmul.f32 %v2837_v36, %v3115_v51 }
 0x110   : > { %v2457_v53 = vpop.f32.mrb[16].mxu0  ;;  %4384 = vst [vmem:[#allocation23_spill] sm:$0xff] %v3117_v11  ;;  %4386 = vst [vmem:[#allocation25_spill] sm:$0xff] %v3137_v37  ;;  %v3157_v43 = vmul.f32 %v2878_v62, %v3115_v51  ;;  %v3162_v45 = vmul.f32 %v2837_v36, %v3117_v11  ;;  %v1258_v61 = vadd.f32 %v2969_v2, %v2894_v9  ;;  %v3185_v2 = vld [vmem:[%s4334_s3 + $0x8] ss:$0 sm:$0xff] }
 0x111   : > { %v522_v6 = vpop.f32.mrb[17].mxu0  ;;  %4387 = vst [vmem:[#allocation26_spill] sm:$0xff] %v3142_v50  ;;  %4388 = vst [vmem:[#allocation27_spill] sm:$0xff] %v3147_v38  ;;  %v1229_v38 = vmul.f32 %v2885_v3, %v2923_v30  ;;  %v3171_v37 = vmul.f32 %v2878_v62, %v3117_v11  ;;  %v1459_v50 = vmul.f32 %v2887_v4, %v2940_v46 }
 0x112   : > { %v2458_v32 = vpop.f32.mrb[18].mxu0  ;;  %4389 = vst [vmem:[#allocation28_spill] sm:$0xff] %v3152_v48  ;;  %4390 = vst [vmem:[#allocation29_spill] sm:$0xff] %v3157_v43  ;;  %v1260_v43 = vadd.f32 %v1228_v22, %v2966_v16  ;;  %v1458_v25 = vmul.f32 %v2887_v4, %v2931_v39  ;;  %v1460_v9 = vmul.f32 %v2887_v4, %v3100_v18 }
 0x113   : > { %v525_v63 = vpop.f32.mrb[19].mxu0  ;;  %4391 = vst [vmem:[#allocation30_spill] sm:$0xff] %v3162_v45  ;;  %4392 = vst [vmem:[#allocation31_spill] sm:$0xff] %v3171_v37  ;;  %v1261_v51 = vadd.f32 %v1229_v38, %v2962_v8  ;;  %v1326_v45 = vadd.f32 %v2907_v17, %v1258_v61  ;;  %v1461_v46 = vmul.f32 %v2887_v4, %v3125_v59 }
 0x114   : > { %v1328_v16 = vadd.f32 %v2903_v12, %v1260_v43  ;;  %v1491_v8 = vadd.f32 %v1459_v50, %v2971_v15  ;;  %v1656_v17 = vmul.f32 %v2889_v5, %v2923_v30  ;;  %v1655_v61 = vmul.f32 %v2889_v5, %v3017_v56 }
 0x115   : > { %v1329_v39 = vadd.f32 %v2960_v0, %v1261_v51  ;;  %v1490_v38 = vadd.f32 %v1458_v25, %v1326_v45  ;;  %v1657_v48 = vmul.f32 %v2889_v5, %v3047_v26  ;;  %v1658_v15 = vmul.f32 %v2889_v5, %v3021_v58 }
 0x116   : > { %v1492_v43 = vadd.f32 %v1460_v9, %v1328_v16  ;;  %v1688_v50 = vadd.f32 %v1656_v17, %v1491_v8  ;;  %v1724_v30 = vmul.f32 %v2883_v1, %v2892_v7  ;;  %v1887_v56 = vmul.f32 %v3185_v2, %v3100_v18 }
 0x117   : > { %v1493_v0 = vadd.f32 %v1461_v46, %v1329_v39  ;;  %v1687_v51 = vadd.f32 %v1655_v61, %v1490_v38  ;;  %v531_v45 = vadd.f32 %v2457_v53, %v2853_v41  ;;  %v1888_v16 = vmul.f32 %v3185_v2, %v3125_v59 }
 0x118   : > { %v3193_v22 = vpop.f32.mrb[20].mxu0  ;;  %v1689_v11 = vadd.f32 %v1657_v48, %v1492_v43  ;;  %v1756_v9 = vadd.f32 %v1724_v30, %v1688_v50  ;;  %v3218_v7 = vsel %vm993_vm3, %v3031_v14, 0.0  ;;  %v523_v39 = vadd.f32 %v2853_v41, %v522_v6 }
 0x119   : > { %v3200_v12 = vpop.f32.mrb[21].mxu0  ;;  %v1690_v8 = vadd.f32 %v1658_v15, %v1493_v0  ;;  %v1755_v46 = vadd.f32 %v2916_v24, %v1687_v51  ;;  %v3221_v17 = vmax.f32 %v531_v45, 0.0  ;;  %v1889_v48 = vmul.f32 %v3185_v2, %v3027_v60 }
 0x11a   : > { %v3206_v37 = vpop.f32.mrb[22].mxu0  ;;  %v1920_v53 = vadd.f32 %v1888_v16, %v1756_v9  ;;  %v1757_v38 = vadd.f32 %v2994_v35, %v1689_v11  ;;  %v534_v61 = vadd.f32 %v2458_v32, %v2853_v41  ;;  %v1034_v43 = vmul.f32 %v2855_v42, %v3100_v18 }
 0x11b   : > { %v3211_v25 = vpop.f32.mrb[23].mxu0  ;;  %4393 = vst [vmem:[#allocation32_spill] sm:$0xff] %v3221_v17  ;;  %v1035_v14 = vmul.f32 %v2855_v42, %v3125_v59  ;;  %v1919_v15 = vadd.f32 %v1887_v56, %v1755_v46  ;;  %v526_v24 = vadd.f32 %v2853_v41, %v525_v63  ;;  %v1758_v50 = vadd.f32 %v3039_v29, %v1690_v8 }
 0x11c   : > { %v1890_v6 = vmul.f32 %v3185_v2, %v3218_v7  ;;  %v1921_v35 = vadd.f32 %v1889_v48, %v1757_v38  ;;  %v3236_v11 = vmax.f32 %v523_v39, 0.0  ;;  %v3241_v18 = vmax.f32 %v534_v61, 0.0 }
 0x11d   : > { %v1951_v32 = vpack.c.bf16 %v1920_v53, %v1919_v15  ;;  %v4395_v59 = vrot.slane %v2964_v13, 7  ;;  %v4396_v51 = vrot.slane %v2950_v54, 7  ;;  %v3255_v56 = vmul.f32 %v2837_v36, %v3221_v17 }
 0x11e   : > { %4394 = vst [vmem:[#allocation33_spill] sm:$0xff] %v3241_v18  ;;  %v3260_v9 = vmul.f32 %v2878_v62, %v3221_v17  ;;  %v1922_v16 = vadd.f32 %v1890_v6, %v1758_v50  ;;  %v3267_v39 = vmul.f32 %v2837_v36, %v3236_v11  ;;  %v3270_v38 = vmax.f32 %v526_v24, 0.0 }
 0x11f   : > { %v3249_v29 = vsel %vm723_vm4, %v4396_v51, %v4395_v59  ;;  %4397 = vst [vmem:[#allocation34_spill] sm:$0xff] %v3255_v56  ;;  %2487 = vmatprep.mubr.bf16.mxu0 %v1951_v32  ;;  %v3276_v15 = vmul.f32 %v2878_v62, %v3236_v11  ;;  %v3281_v6 = vmul.f32 %v2837_v36, %v3241_v18  ;;  %v4402_v24 = vrot.slane %v3054_v49, 7 }
 0x120   : > { %v3238_v30 = vpop.f32.mrb[24].mxu0  ;;  %4398 = vst [vmem:[#allocation35_spill] sm:$0xff] %v3260_v9  ;;  %v1952_v61 = vpack.c.bf16 %v1922_v16, %v1921_v35  ;;  %v3286_v59 = vmul.f32 %v2878_v62, %v3241_v18  ;;  %v4403_v35 = vrot.slane %v3011_v52, 7  ;;  %v4404_v16 = vrot.slane %v2950_v54, 7 }
 0x121   : > { %v3251_v63 = vpop.f32.mrb[25].mxu0  ;;  %4399 = vst [vmem:[#allocation36_spill] sm:$0xff] %v3276_v15  ;;  %4400 = vst [vmem:[#allocation37_spill] sm:$0xff] %v3281_v6  ;;  %v4405_v45 = vrot.slane %v2964_v13, 7  ;;  %v4407_v50 = vmov %v4402_v24  ;;  %v947_v9 = vrot.slane %v2964_v13, 1  ;;  %v1036_v56 = vmul.f32 %v2855_v42, %v3027_v60 }
 0x122   : > { %v3262_v8 = vpop.f32.mrb[26].mxu0  ;;  %4401 = vst [vmem:[#allocation38_spill] sm:$0xff] %v3286_v59  ;;  %v3294_v51 = vsel %vm723_vm4, %v4403_v35, %v4402_v24  ;;  %2488 = vmatmul.mubr.bf16.vlgmr.msra.gmra.mrb[32].mxu0 %v1952_v61  ;;  %v4406_v32 = vmov %v4403_v35  ;;  %v801_v24 = vmul.f32 %v2834_v34, %v3047_v26  ;;  %v804_v35 = vmul.f32 %v2834_v34, %v3249_v29 }
 0x123   : > { %v3272_v48 = vpop.f32.mrb[27].mxu0  ;;  %v744_v0 = vsel %vm723_vm4, %v4405_v45, %v4404_v16  ;;  %v745_v53 = vsel %vm723_vm4, %v4407_v50, %v4406_v32  ;;  %v899_v16 = vadd.f32 %v2898_v10, %v3121_v57  ;;  %v900_v50 = vadd.f32 %v2912_v20, %v3043_v31 }
 0x124   : > { %v767_v46 = vsel %vm757_vm2, %v744_v0, 0.0  ;;  %v3316_v45 = vsel %vm757_vm2, %v745_v53, 0.0  ;;  %v901_v0 = vadd.f32 %v2985_v23, %v801_v24  ;;  %v904_v32 = vadd.f32 %v2999_v44, %v804_v35 }
 0x125   : > { %v803_v61 = vmul.f32 %v2834_v34, %v767_v46  ;;  %v931_v59 = vrot.slane %v2950_v54, 1  ;;  %v1037_v10 = vmul.f32 %v2855_v42, %v3218_v7  ;;  %v1066_v57 = vadd.f32 %v1034_v43, %v899_v16 }
 0x126   : > { %v1067_v31 = vadd.f32 %v1035_v14, %v900_v50  ;;  %v1230_v24 = vmul.f32 %v2885_v3, %v3047_v26  ;;  %v1068_v43 = vadd.f32 %v1036_v56, %v901_v0  ;;  %v1231_v14 = vmul.f32 %v2885_v3, %v3021_v58 }
 0x127   : > { %v903_v53 = vadd.f32 %v2976_v19, %v803_v61  ;;  %v964_v23 = vsel %vm959_vm5, %v931_v59, %v947_v9  ;;  %v980_v44 = vsel %vm959_vm5, %v947_v9, %v931_v59  ;;  %v1069_v16 = vadd.f32 %v1037_v10, %v3056_v40 }
 0x128   : > { %v3327_v15 = vpop.f32.mrb[28].mxu0  ;;  %v1003_v35 = vsel %vm993_vm3, %v980_v44, 0.0  ;;  %v1038_v61 = vmul.f32 %v2855_v42, %v964_v23  ;;  %v1232_v9 = vmul.f32 %v2885_v3, %v767_v46  ;;  %v1233_v26 = vmul.f32 %v2885_v3, %v3249_v29 }
 0x129   : > { %v3334_v20 = vpop.f32.mrb[29].mxu0  ;;  %v1039_v17 = vmul.f32 %v2855_v42, %v1003_v35  ;;  %v1234_v50 = vmul.f32 %v2885_v3, %v3316_v45  ;;  %v1235_v56 = vmul.f32 %v2885_v3, %v3294_v51  ;;  %v1262_v40 = vadd.f32 %v1230_v24, %v1066_v57 }
 0x12a   : > { %4408 = vst [vmem:[#allocation39_spill] sm:$0xff] %v3334_v20  ;;  %v3342_v19 = vpop.f32.mrb[30].mxu0  ;;  %v1070_v59 = vadd.f32 %v1038_v61, %v903_v53  ;;  %v1263_v10 = vadd.f32 %v1231_v14, %v1067_v31  ;;  %v1264_v44 = vadd.f32 %v1232_v9, %v1068_v43  ;;  %v1265_v18 = vadd.f32 %v1233_v26, %v1069_v16 }
 0x12b   : > { %4409 = vst [vmem:[#allocation40_spill] sm:$0xff] %v3342_v19  ;;  %v3348_v6 = vpop.f32.mrb[31].mxu0  ;;  %v1071_v0 = vadd.f32 %v1039_v17, %v904_v32  ;;  %v1298_v58 = vmul.f32 %v2878_v62, %v2952_v55  ;;  %v1299_v19 = vmul.f32 %v2878_v62, %v2988_v28  ;;  %v1462_v53 = vmul.f32 %v2887_v4, %v3027_v60 }
 0x12c   : > { %4410 = vst [vmem:[#allocation41_spill] sm:$0xff] %v3348_v6  ;;  %v3360_v6 = vadd.f32 %v1234_v50, %v1070_v59  ;;  %v1332_v20 = vadd.f32 %v2980_v21, %v1264_v44  ;;  %v1333_v17 = vadd.f32 %v3004_v47, %v1265_v18  ;;  %v1463_v32 = vmul.f32 %v2887_v4, %v3218_v7 }
 0x12d   : > { %v3368_v61 = vadd.f32 %v1235_v56, %v1071_v0  ;;  %v1330_v57 = vadd.f32 %v1298_v58, %v1262_v40  ;;  %v1331_v31 = vadd.f32 %v1299_v19, %v1263_v10  ;;  %v1464_v24 = vmul.f32 %v2887_v4, %v964_v23  ;;  %v4416_v58 = vld [vmem:[#allocation18_spill] sm:$0xff] }
 0x12e   : > { %v1465_v55 = vmul.f32 %v2887_v4, %v1003_v35  ;;  %v1659_v28 = vmul.f32 %v2889_v5, %v767_v46  ;;  %v1660_v60 = vmul.f32 %v2889_v5, %v3249_v29  ;;  %v1727_v43 = vmul.f32 %v2883_v1, %v2950_v54 }
 0x12f   : > { %v1728_v21 = vmul.f32 %v2883_v1, %v2964_v13  ;;  %v1494_v47 = vadd.f32 %v1462_v53, %v1330_v57  ;;  %v1495_v18 = vadd.f32 %v1463_v32, %v1331_v31  ;;  %v1496_v7 = vadd.f32 %v1464_v24, %v1332_v20 }
 0x130   : > { %v1497_v16 = vadd.f32 %v1465_v55, %v1333_v17  ;;  %v1891_v19 = vmul.f32 %v3185_v2, %v964_v23  ;;  %v1892_v14 = vmul.f32 %v3185_v2, %v1003_v35  ;;  %v547_v46 = vadd.f32 %v3193_v22, %v2853_v41  ;;  %v4413_v35 = vld [vmem:[#allocation14_spill] sm:$0xff] }
 0x131   : > { %v805_v29 = vmul.f32 %v2834_v34, %v3316_v45  ;;  %v1691_v9 = vadd.f32 %v1659_v28, %v1494_v47  ;;  %v1692_v26 = vadd.f32 %v1660_v60, %v1495_v18  ;;  %v806_v54 = vmul.f32 %v2834_v34, %v3294_v51 }
 0x132   : > { %v4411_v13 = vrot.slane %v3054_v49, 1  ;;  %v4412_v20 = vrot.slane %v3011_v52, 1  ;;  %v3397_v59 = vmax.f32 %v547_v46, 0.0  ;;  %v3413_v57 = vmul.f32 %v2837_v36, %v3270_v38 }
 0x133   : > { %v905_v50 = vadd.f32 %v4413_v35, %v805_v29  ;;  %v1759_v10 = vadd.f32 %v1727_v43, %v1691_v9  ;;  %v1760_v44 = vadd.f32 %v1728_v21, %v1692_v26  ;;  %v906_v53 = vadd.f32 %v4416_v58, %v806_v54 }
 0x134   : > { %v965_v23 = vsel %vm959_vm5, %v4412_v20, %v4411_v13  ;;  %v4414_v22 = vmov %v4412_v20  ;;  %v4415_v56 = vmov %v4411_v13  ;;  %v3418_v24 = vmul.f32 %v2878_v62, %v3270_v38 }
 0x135   : > { %v981_v40 = vsel %vm959_vm5, %v4415_v56, %v4414_v22  ;;  %v1040_v0 = vmul.f32 %v2855_v42, %v965_v23  ;;  %v1923_v55 = vadd.f32 %v1891_v19, %v1759_v10  ;;  %v1924_v28 = vadd.f32 %v1892_v14, %v1760_v44  ;;  %v4419_v22 = vld [vmem:[#allocation10_spill] sm:$0xff] }
 0x136   : > { %v1005_v17 = vsel %vm993_vm3, %v981_v40, 0.0  ;;  %v3426_v47 = vmul.f32 %v2837_v36, %v3397_v59  ;;  %v1661_v18 = vmul.f32 %v2889_v5, %v3316_v45  ;;  %v1662_v46 = vmul.f32 %v2889_v5, %v3294_v51 }
 0x137   : > { %v1041_v60 = vmul.f32 %v2855_v42, %v1005_v17  ;;  %v3421_v43 = vadd.f32 %v1040_v0, %v905_v50  ;;  %v1953_v29 = vpack.c.bf16 %v1924_v28, %v1923_v55  ;;  %v1729_v19 = vmul.f32 %v2883_v1, %v3011_v52  ;;  %v4417_v52 = vld [vmem:[#allocation11_spill] sm:$0xff] }
 0x138   : > { %v1730_v14 = vmul.f32 %v2883_v1, %v3054_v49  ;;  %v1693_v26 = vadd.f32 %v1661_v18, %v1496_v7  ;;  %v1694_v54 = vadd.f32 %v1662_v46, %v1497_v16  ;;  %v1893_v13 = vmul.f32 %v3185_v2, %v965_v23 }
 0x139   : > { %v3432_v9 = vadd.f32 %v1041_v60, %v906_v53  ;;  %v1894_v20 = vmul.f32 %v3185_v2, %v1005_v17  ;;  %2491 = vmatprep.mubr.bf16.mxu1 %v1953_v29  ;;  %v539_v45 = vadd.f32 %v2853_v41, %v3200_v12  ;;  %v550_v51 = vadd.f32 %v3206_v37, %v2853_v41  ;;  %v4423_v60 = vld [vmem:[#allocation16_spill] sm:$0xff] }
 0x13a   : > { %v542_v35 = vadd.f32 %v2853_v41, %v3211_v25  ;;  %v4418_v50 = vrot.slane %v4417_v52, 7  ;;  %v4420_v49 = vrot.slane %v4419_v22, 7  ;;  %v1761_v16 = vadd.f32 %v1729_v19, %v1693_v26 }
 0x13b   : > { %v1762_v56 = vadd.f32 %v1730_v14, %v1694_v54  ;;  %v3463_v10 = vmax.f32 %v539_v45, 0.0  ;;  %v3465_v44 = vmax.f32 %v550_v51, 0.0  ;;  %v3473_v46 = vmul.f32 %v2878_v62, %v3397_v59 }
 0x13c   : > { %v3452_v7 = vsel %vm723_vm4, %v4420_v49, %v4418_v50  ;;  %v4421_v40 = vmov %v4420_v49  ;;  %v4422_v12 = vmov %v4418_v50  ;;  %v1925_v53 = vadd.f32 %v1893_v13, %v1761_v16  ;;  %v4426_v50 = vld [vmem:[#allocation12_spill] sm:$0xff] }
 0x13d   : > { %v746_v37 = vsel %vm723_vm4, %v4422_v12, %v4421_v40  ;;  %v808_v25 = vmul.f32 %v2834_v34, %v3452_v7  ;;  %v1926_v55 = vadd.f32 %v1894_v20, %v1762_v56  ;;  %4424 = vst [vmem:[#allocation14_spill] sm:$0xff] %v3473_v46  ;;  %v1466_v29 = vmul.f32 %v2887_v4, %v965_v23 }
 0x13e   : > { %v771_v58 = vsel %vm757_vm2, %v746_v37, 0.0  ;;  %v1467_v19 = vmul.f32 %v2887_v4, %v1005_v17  ;;  %v3477_v14 = vmax.f32 %v542_v35, 0.0  ;;  %v3482_v13 = vmul.f32 %v2837_v36, %v3463_v10 }
 0x13f   : > { %v807_v28 = vmul.f32 %v2834_v34, %v771_v58  ;;  %v908_v18 = vadd.f32 %v4423_v60, %v808_v25  ;;  %v1954_v26 = vpack.c.bf16 %v1926_v55, %v1925_v53  ;;  %v3487_v45 = vmul.f32 %v2878_v62, %v3463_v10  ;;  %v4434_v53 = vld [vmem:[#allocation23_spill] sm:$0xff] }
 0x140   : > { %v3492_v23 = vmul.f32 %v2837_v36, %v3465_v44  ;;  %v3497_v35 = vmul.f32 %v2878_v62, %v3465_v44  ;;  %v4427_v16 = vrot.slane %v4417_v52, 1  ;;  %v4428_v56 = vrot.slane %v4419_v22, 1 }
 0x141   : > { %2492 = vmatmul.mubr.bf16.vlgmr.msra.gmra.mrb[0].mxu1 %v1954_v26  ;;  %v907_v49 = vadd.f32 %v4426_v50, %v807_v28  ;;  %v3515_v55 = vmul.f32 %v2837_v36, %v3477_v14  ;;  %v3528_v0 = vmul.f32 %v2878_v62, %v3477_v14  ;;  %v1664_v21 = vmul.f32 %v2889_v5, %v3452_v7 }
 0x142   : > { %4425 = vst [vmem:[#allocation18_spill] sm:$0xff] %v3497_v35  ;;  %v966_v40 = vsel %vm959_vm5, %v4428_v56, %v4427_v16  ;;  %v4429_v12 = vmov %v4428_v56  ;;  %v4430_v37 = vmov %v4427_v16  ;;  %v4431_v16 = vld [vmem:[#allocation15_spill] sm:$0xff]  ;;  %v1237_v32 = vmul.f32 %v2885_v3, %v3452_v7 }
 0x143   : > { %v982_v25 = vsel %vm959_vm5, %v4430_v37, %v4429_v12  ;;  %v1042_v60 = vmul.f32 %v2855_v42, %v966_v40  ;;  %v1334_v56 = vadd.f32 %v4431_v16, %v3360_v6  ;;  %v4432_v12 = vld [vmem:[#allocation20_spill] sm:$0xff]  ;;  %4433 = vst [vmem:[#allocation11_spill] sm:$0xff] %v3528_v0  ;;  %v1731_v6 = vmul.f32 %v2883_v1, %v4419_v22 }
 0x144   : > { %v1007_v28 = vsel %vm993_vm3, %v982_v25, 0.0  ;;  %v1335_v37 = vadd.f32 %v4432_v12, %v3368_v61  ;;  %v1663_v25 = vmul.f32 %v2889_v5, %v771_v58  ;;  %v1732_v61 = vmul.f32 %v2883_v1, %v4417_v52 }
 0x145   : > { %v1043_v50 = vmul.f32 %v2855_v42, %v1007_v28  ;;  %v3530_v17 = vadd.f32 %v1042_v60, %v907_v49  ;;  %v1498_v20 = vadd.f32 %v1466_v29, %v1334_v56  ;;  %v1895_v16 = vmul.f32 %v3185_v2, %v966_v40 }
 0x146   : > { %v1499_v26 = vadd.f32 %v1467_v19, %v1335_v37  ;;  %v1896_v49 = vmul.f32 %v3185_v2, %v1007_v28  ;;  %v563_v60 = vadd.f32 %v3238_v30, %v2853_v41  ;;  %v1468_v35 = vmul.f32 %v2887_v4, %v966_v40 }
 0x147   : > { %v3535_v51 = vadd.f32 %v1043_v50, %v908_v18  ;;  %v1695_v12 = vadd.f32 %v1663_v25, %v1498_v20  ;;  %v4435_v18 = vrot.slane %v4434_v53, 7  ;;  %v4436_v50 = vld [vmem:[#allocation21_spill] sm:$0xff]  ;;  %v4440_v20 = vrot.slane %v4434_v53, 1 }
 0x148   : > { %v1696_v54 = vadd.f32 %v1664_v21, %v1499_v26  ;;  %v4437_v29 = vrot.slane %v4436_v50, 7  ;;  %v3557_v37 = vmax.f32 %v563_v60, 0.0  ;;  %v4441_v26 = vrot.slane %v4436_v50, 1 }
 0x149   : > { %v4439_v52 = vmov %v4435_v18  ;;  %v4443_v60 = vmov %v4440_v20 }
 0x14a   : > { %v731_v19 = vsel %vm723_vm4, %v4437_v29, %v4435_v18  ;;  %v4438_v22 = vmov %v4437_v29  ;;  %v967_v25 = vsel %vm959_vm5, %v4441_v26, %v4440_v20  ;;  %v1763_v18 = vadd.f32 %v1731_v6, %v1695_v12 }
 0x14b   : > { %v747_v56 = vsel %vm723_vm4, %v4439_v52, %v4438_v22  ;;  %v810_v21 = vmul.f32 %v2834_v34, %v731_v19  ;;  %v1764_v29 = vadd.f32 %v1732_v61, %v1696_v54  ;;  %v4442_v22 = vmov %v4441_v26  ;;  %v4444_v61 = vld [vmem:[#allocation26_spill] sm:$0xff] }
 0x14c   : > { %v773_v30 = vsel %vm757_vm2, %v747_v56, 0.0  ;;  %v983_v52 = vsel %vm959_vm5, %v4443_v60, %v4442_v22  ;;  %v1236_v56 = vmul.f32 %v2885_v3, %v771_v58  ;;  %v1469_v20 = vmul.f32 %v2887_v4, %v1007_v28  ;;  %v4445_v26 = vld [vmem:[#allocation30_spill] sm:$0xff] }
 0x14d   : > { %v809_v31 = vmul.f32 %v2834_v34, %v773_v30  ;;  %v1927_v6 = vadd.f32 %v1895_v16, %v1763_v18  ;;  %v1928_v54 = vadd.f32 %v1896_v49, %v1764_v29  ;;  %v910_v46 = vadd.f32 %v4445_v26, %v810_v21 }
 0x14e   : > { %v3585_v22 = vmul.f32 %v2837_v36, %v3557_v37  ;;  %v1009_v58 = vsel %vm993_vm3, %v983_v52, 0.0  ;;  %v1044_v7 = vmul.f32 %v2855_v42, %v967_v25  ;;  %v1268_v16 = vadd.f32 %v1236_v56, %v3421_v43  ;;  %v4449_v43 = vld [vmem:[#allocation17_spill] sm:$0xff] }
 0x14f   : > { %v909_v12 = vadd.f32 %v4444_v61, %v809_v31  ;;  %v1955_v40 = vpack.c.bf16 %v1928_v54, %v1927_v6  ;;  %v1045_v28 = vmul.f32 %v2855_v42, %v1009_v58  ;;  %v1269_v31 = vadd.f32 %v1237_v32, %v3432_v9  ;;  %v4448_v6 = vld [vmem:[#allocation13_spill] sm:$0xff] }
 0x150   : > { %4446 = vst [vmem:[#allocation10_spill] sm:$0xff] %v3585_v22  ;;  %v3596_v21 = vmul.f32 %v2878_v62, %v3557_v37  ;;  %v1238_v29 = vmul.f32 %v2885_v3, %v773_v30  ;;  %v1239_v52 = vmul.f32 %v2885_v3, %v731_v19  ;;  %v1336_v54 = vadd.f32 %v4448_v6, %v1268_v16  ;;  %v4450_v16 = vld [vmem:[#allocation22_spill] sm:$0xff]  ;;  %v4452_v6 = vld [vmem:[#allocation19_spill] sm:$0xff] }
 0x151   : > { %v3598_v18 = vadd.f32 %v1044_v7, %v909_v12  ;;  %2495 = vmatprep.mubr.bf16.mxu1 %v1955_v40  ;;  %v3601_v60 = vadd.f32 %v1045_v28, %v910_v46  ;;  %v1337_v56 = vadd.f32 %v4449_v43, %v1269_v31  ;;  %v1470_v32 = vmul.f32 %v2887_v4, %v967_v25 }
 0x152   : > { %4447 = vst [vmem:[#allocation16_spill] sm:$0xff] %v3596_v21  ;;  %v1665_v9 = vmul.f32 %v2889_v5, %v773_v30  ;;  %v1666_v61 = vmul.f32 %v2889_v5, %v731_v19  ;;  %v1733_v12 = vmul.f32 %v2883_v1, %v4436_v50  ;;  %v1500_v26 = vadd.f32 %v1468_v35, %v1336_v54 }
 0x153   : > { %v1501_v7 = vadd.f32 %v1469_v20, %v1337_v56  ;;  %v555_v46 = vadd.f32 %v2853_v41, %v3251_v63  ;;  %v566_v40 = vadd.f32 %v3262_v8, %v2853_v41  ;;  %v558_v28 = vadd.f32 %v2853_v41, %v3272_v48 }
 0x154   : > { %v4451_v31 = vrot.slane %v4450_v16, 7  ;;  %v4453_v30 = vrot.slane %v4452_v6, 7  ;;  %v4456_v20 = vrot.slane %v4450_v16, 1  ;;  %v4457_v8 = vrot.slane %v4452_v6, 1 }
 0x155   : > { %v1697_v54 = vadd.f32 %v1665_v9, %v1500_v26  ;;  %v1698_v43 = vadd.f32 %v1666_v61, %v1501_v7  ;;  %v1734_v56 = vmul.f32 %v2883_v1, %v4434_v53  ;;  %v1897_v49 = vmul.f32 %v3185_v2, %v967_v25 }
 0x156   : > { %v732_v19 = vsel %vm723_vm4, %v4453_v30, %v4451_v31  ;;  %v4454_v50 = vmov %v4453_v30  ;;  %v4455_v35 = vmov %v4451_v31  ;;  %v3635_v48 = vsel %vm959_vm5, %v4457_v8, %v4456_v20 }
 0x157   : > { %v748_v63 = vsel %vm723_vm4, %v4455_v35, %v4454_v50  ;;  %v3639_v31 = vmax.f32 %v555_v46, 0.0  ;;  %v1471_v30 = vmul.f32 %v2887_v4, %v1009_v58  ;;  %v3643_v50 = vmax.f32 %v566_v40, 0.0 }
 0x158   : > { %v4458_v35 = vmov %v4457_v8  ;;  %v4459_v0 = vmov %v4456_v20  ;;  %v1765_v9 = vadd.f32 %v1733_v12, %v1697_v54  ;;  %v1766_v61 = vadd.f32 %v1734_v56, %v1698_v43  ;;  %v4462_v56 = vld [vmem:[#allocation28_spill] sm:$0xff] }
 0x159   : > { %v984_v20 = vsel %vm959_vm5, %v4459_v0, %v4458_v35  ;;  %v1898_v26 = vmul.f32 %v3185_v2, %v1009_v58  ;;  %v812_v53 = vmul.f32 %v2834_v34, %v732_v19  ;;  %v3656_v25 = vmul.f32 %v2837_v36, %v3639_v31  ;;  %v4463_v0 = vld [vmem:[#allocation24_spill] sm:$0xff] }
 0x15a   : > { %v3658_v46 = vmax.f32 %v558_v28, 0.0  ;;  %v775_v40 = vsel %vm757_vm2, %v748_v63, 0.0  ;;  %v1929_v8 = vadd.f32 %v1897_v49, %v1765_v9  ;;  %v3665_v58 = vmul.f32 %v2878_v62, %v3639_v31 }
 0x15b   : > { %v1930_v21 = vadd.f32 %v1898_v26, %v1766_v61  ;;  %v3670_v54 = vmul.f32 %v2837_v36, %v3643_v50  ;;  %v3675_v43 = vmul.f32 %v2878_v62, %v3643_v50  ;;  %v811_v63 = vmul.f32 %v2834_v34, %v775_v40 }
 0x15c   : > { %4460 = vst [vmem:[#allocation12_spill] sm:$0xff] %v3665_v58  ;;  %v912_v35 = vadd.f32 %v4462_v56, %v812_v53  ;;  %v1011_v9 = vsel %vm993_vm3, %v984_v20, 0.0  ;;  %v3684_v26 = vmul.f32 %v2837_v36, %v3658_v46  ;;  %v1270_v53 = vadd.f32 %v1238_v29, %v3530_v17 }
 0x15d   : > { %4461 = vst [vmem:[#allocation15_spill] sm:$0xff] %v3675_v43  ;;  %v1956_v49 = vpack.c.bf16 %v1930_v21, %v1929_v8  ;;  %v1047_v12 = vmul.f32 %v2855_v42, %v1011_v9  ;;  %v911_v21 = vadd.f32 %v4463_v0, %v811_v63  ;;  %v1046_v8 = vmul.f32 %v2855_v42, %v3635_v48  ;;  %v4465_v0 = vld [vmem:[#allocation27_spill] sm:$0xff] }
 0x15e   : > { %v1271_v20 = vadd.f32 %v1239_v52, %v3535_v51  ;;  %v3695_v56 = vmul.f32 %v2878_v62, %v3658_v46  ;;  %v1240_v28 = vmul.f32 %v2885_v3, %v775_v40  ;;  %v1241_v61 = vmul.f32 %v2885_v3, %v732_v19  ;;  %v4466_v43 = vld [vmem:[#allocation31_spill] sm:$0xff] }
 0x15f   : > { %2496 = vmatmul.mubr.bf16.gmra.mrb[4].mxu1 %v1956_v49  ;;  %v3697_v7 = vadd.f32 %v1047_v12, %v912_v35  ;;  %v3701_v49 = vadd.f32 %v1046_v8, %v911_v21  ;;  %v1338_v63 = vadd.f32 %v4465_v0, %v1270_v53  ;;  %v1667_v17 = vmul.f32 %v2889_v5, %v775_v40 }
 0x160   : > { %4464 = vst [vmem:[#allocation20_spill] sm:$0xff] %v3695_v56  ;;  %v1339_v58 = vadd.f32 %v4466_v43, %v1271_v20  ;;  %v1668_v51 = vmul.f32 %v2889_v5, %v732_v19  ;;  %v1735_v29 = vmul.f32 %v2883_v1, %v4452_v6  ;;  %v1736_v52 = vmul.f32 %v2883_v1, %v4450_v16 }
 0x161   : > { %v579_v12 = vadd.f32 %v3327_v15, %v2853_v41  ;;  %v1502_v35 = vadd.f32 %v1470_v32, %v1338_v63  ;;  %v4467_v8 = vrot.slane %v3270_v38, 7  ;;  %v4468_v53 = vrot.slane %v3236_v11, 7 }
 0x162   : > { %v1503_v21 = vadd.f32 %v1471_v30, %v1339_v58  ;;  %v4472_v32 = vrot.slane %v3270_v38, 1  ;;  %v4473_v30 = vrot.slane %v3236_v11, 1 }
 0x163   : > { %v733_v40 = vsel %vm723_vm4, %v4468_v53, %v4467_v8  ;;  %v4469_v19 = vmov %v4468_v53  ;;  %v4470_v43 = vmov %v4467_v8  ;;  %v3725_v16 = vmax.f32 %v579_v12, 0.0 }
 0x164   : > { %v749_v6 = vsel %vm723_vm4, %v4470_v43, %v4469_v19  ;;  %v814_v15 = vmul.f32 %v2834_v34, %v733_v40  ;;  %v969_v58 = vsel %vm959_vm5, %v4473_v30, %v4472_v32  ;;  %v1699_v20 = vadd.f32 %v1667_v17, %v1502_v35 }
 0x165   : > { %4471 = vst [vmem:[#allocation23_spill] sm:$0xff] %v3725_v16  ;;  %v777_v41 = vsel %vm757_vm2, %v749_v6, 0.0  ;;  %v1700_v0 = vadd.f32 %v1668_v51, %v1503_v21  ;;  %v4474_v8 = vmov %v4473_v30  ;;  %v4475_v12 = vmov %v4472_v32  ;;  %v4485_v30 = vld [vmem:[#allocation32_spill] sm:$0xff] }
 0x166   : > { %v813_v63 = vmul.f32 %v2834_v34, %v777_v41  ;;  %v985_v53 = vsel %vm959_vm5, %v4475_v12, %v4474_v8  ;;  %v1472_v19 = vmul.f32 %v2887_v4, %v3635_v48  ;;  %v1473_v43 = vmul.f32 %v2887_v4, %v1011_v9 }
 0x167   : > { %v1899_v6 = vmul.f32 %v3185_v2, %v3635_v48  ;;  %v1900_v17 = vmul.f32 %v3185_v2, %v1011_v9  ;;  %v1767_v51 = vadd.f32 %v1735_v29, %v1699_v20  ;;  %v1768_v35 = vadd.f32 %v1736_v52, %v1700_v0 }
 0x168   : > { %v913_v21 = vadd.f32 %v3267_v39, %v813_v63  ;;  %v914_v32 = vadd.f32 %v3413_v57, %v814_v15  ;;  %v3754_v8 = vmul.f32 %v2878_v62, %v3725_v16  ;;  %v1013_v12 = vsel %vm993_vm3, %v985_v53, 0.0  ;;  %v4478_v53 = vld [vmem:[#allocation25_spill] sm:$0xff] }
 0x169   : > { %v1048_v56 = vmul.f32 %v2855_v42, %v969_v58  ;;  %v1931_v48 = vadd.f32 %v1899_v6, %v1767_v51  ;;  %v1932_v22 = vadd.f32 %v1900_v17, %v1768_v35  ;;  %v1049_v9 = vmul.f32 %v2855_v42, %v1013_v12 }
 0x16a   : > { %4476 = vst [vmem:[#allocation21_spill] sm:$0xff] %v3754_v8  ;;  %v1272_v29 = vadd.f32 %v1240_v28, %v3598_v18  ;;  %v3764_v57 = vmul.f32 %v2883_v1, %v3725_v16  ;;  %v1273_v15 = vadd.f32 %v1241_v61, %v3601_v60  ;;  %v1242_v63 = vmul.f32 %v2885_v3, %v777_v41  ;;  %v4479_v18 = vld [vmem:[#allocation29_spill] sm:$0xff]  ;;  %v2602_v61 = vld [vmem:[%s4333_s2] ss:$0 sm:$0xff] }
 0x16b   : > { %v3766_v52 = vadd.f32 %v1048_v56, %v913_v21  ;;  %v1957_v20 = vpack.c.bf16 %v1932_v22, %v1931_v48  ;;  %v3769_v0 = vadd.f32 %v1049_v9, %v914_v32  ;;  %v1243_v17 = vmul.f32 %v2885_v3, %v733_v40  ;;  %v4480_v21 = vld [vmem:[#allocation39_spill] sm:$0xff]  ;;  %v4481_v9 = vld [vmem:[#allocation40_spill] sm:$0xff] }
 0x16c   : > { %4477 = vst [vmem:[#allocation26_spill] sm:$0xff] %v3764_v57  ;;  %v1340_v6 = vadd.f32 %v4478_v53, %v1272_v29  ;;  %v1341_v28 = vadd.f32 %v4479_v18, %v1273_v15  ;;  %v1474_v51 = vmul.f32 %v2887_v4, %v969_v58  ;;  %v3777_v35 = vmul.f32 %v2887_v4, %v1013_v12  ;;  %v4482_v15 = vld [vmem:[#allocation41_spill] sm:$0xff] }
 0x16d   : > { %2499 = vmatprep.mubr.bf16.mxu1 %v1957_v20  ;;  %v1669_v60 = vmul.f32 %v2889_v5, %v777_v41  ;;  %v1670_v22 = vmul.f32 %v2889_v5, %v733_v40  ;;  %v571_v32 = vadd.f32 %v2602_v61, %v4480_v21  ;;  %v582_v29 = vadd.f32 %v2602_v61, %v4481_v9  ;;  %v4483_v18 = vld [vmem:[#allocation33_spill] sm:$0xff] }
 0x16e   : > { %v1504_v56 = vadd.f32 %v1472_v19, %v1340_v6  ;;  %v1505_v48 = vadd.f32 %v1473_v43, %v1341_v28  ;;  %v574_v53 = vadd.f32 %v2602_v61, %v4482_v15  ;;  %v4484_v39 = vrot.slane %v4483_v18, 7 }
 0x16f   : > { %v4486_v20 = vrot.slane %v4485_v30, 7  ;;  %v1737_v40 = vmul.f32 %v2883_v1, %v3236_v11  ;;  %v3795_v6 = vmax.f32 %v571_v32, 0.0  ;;  %v1738_v9 = vmul.f32 %v2883_v1, %v3270_v38 }
 0x170   : > { %v1701_v19 = vadd.f32 %v1669_v60, %v1504_v56  ;;  %v4488_v43 = vmov %v4484_v39  ;;  %v1702_v61 = vadd.f32 %v1670_v22, %v1505_v48  ;;  %v1901_v15 = vmul.f32 %v3185_v2, %v969_v58 }
 0x171   : > { %v734_v41 = vsel %vm723_vm4, %v4486_v20, %v4484_v39  ;;  %v4487_v21 = vmov %v4486_v20  ;;  %v3806_v39 = vmax.f32 %v582_v29, 0.0  ;;  %v1902_v11 = vmul.f32 %v3185_v2, %v1013_v12 }
 0x172   : > { %v750_v28 = vsel %vm723_vm4, %v4488_v43, %v4487_v21  ;;  %v1769_v56 = vadd.f32 %v1737_v40, %v1701_v19  ;;  %v3809_v60 = vmax.f32 %v574_v53, 0.0  ;;  %v816_v32 = vmul.f32 %v2834_v34, %v734_v41 }
 0x173   : > { %v1770_v20 = vadd.f32 %v1738_v9, %v1702_v61  ;;  %v4358_v21 = vrot.slane %v3806_v39, 7  ;;  %v779_v22 = vsel %vm757_vm2, %v750_v28, 0.0  ;;  %v3818_v58 = vmul.f32 %v2837_v36, %v3795_v6  ;;  %v4494_v9 = vld [vmem:[#allocation37_spill] sm:$0xff] }
 0x174   : > { %v1933_v38 = vadd.f32 %v1901_v15, %v1769_v56  ;;  %v3823_v12 = vmul.f32 %v2878_v62, %v3795_v6  ;;  %v4490_v53 = vrot.slane %v3725_v16, 7  ;;  %v3835_v40 = vmul.f32 %v2878_v62, %v3806_v39  ;;  %v4510_v16 = vld [vmem:[#allocation38_spill] sm:$0xff] }
 0x175   : > { %v1934_v29 = vadd.f32 %v1902_v11, %v1770_v20  ;;  %v3840_v28 = vmul.f32 %v2883_v1, %v3806_v39  ;;  %v815_v61 = vmul.f32 %v2834_v34, %v779_v22  ;;  %v916_v15 = vadd.f32 %v4494_v9, %v816_v32  ;;  %v4499_v9 = vld [vmem:[#allocation34_spill] sm:$0xff] }
 0x176   : > { %4489 = vst [vmem:[#allocation30_spill] sm:$0xff] %v3823_v12  ;;  %v3831_v19 = vsel %vm723_vm4, %v4358_v21, %v4490_v53  ;;  %4492 = vst [vmem:[#allocation17_spill] sm:$0xff] %v3835_v40  ;;  %v4495_v56 = vrot.slane %v4483_v18, 1  ;;  %v4496_v11 = vrot.slane %v4485_v30, 1  ;;  %v3853_v43 = vmul.f32 %v2837_v36, %v3809_v60 }
 0x177   : > { %4491 = vst [vmem:[#allocation13_spill] sm:$0xff] %v3831_v19  ;;  %4493 = vst [vmem:[#allocation22_spill] sm:$0xff] %v3840_v28  ;;  %v1958_v53 = vpack.c.bf16 %v1934_v29, %v1933_v38  ;;  %v915_v28 = vadd.f32 %v4499_v9, %v815_v61  ;;  %v1274_v29 = vadd.f32 %v1242_v63, %v3701_v49 }
 0x178   : > { %v970_v20 = vsel %vm959_vm5, %v4496_v11, %v4495_v56  ;;  %v4497_v48 = vmov %v4496_v11  ;;  %v4498_v8 = vmov %v4495_v56  ;;  %v1244_v11 = vmul.f32 %v2885_v3, %v779_v22 }
 0x179   : > { %v986_v32 = vsel %vm959_vm5, %v4498_v8, %v4497_v48  ;;  %v1050_v38 = vmul.f32 %v2855_v42, %v970_v20  ;;  %2500 = vmatmul.mubr.bf16.gmra.mrb[8].mxu1 %v1958_v53  ;;  %v1275_v21 = vadd.f32 %v1243_v17, %v3697_v7  ;;  %v1245_v8 = vmul.f32 %v2885_v3, %v734_v41  ;;  %v4500_v48 = vld [vmem:[#allocation36_spill] sm:$0xff] }
 0x17a   : > { %v1015_v40 = vsel %vm993_vm3, %v986_v32, 0.0  ;;  %v1342_v61 = vadd.f32 %v4500_v48, %v1274_v29  ;;  %v1476_v32 = vmul.f32 %v2887_v4, %v970_v20  ;;  %v1671_v63 = vmul.f32 %v2889_v5, %v779_v22 }
 0x17b   : > { %v1051_v56 = vmul.f32 %v2855_v42, %v1015_v40  ;;  %v3870_v57 = vadd.f32 %v1050_v38, %v915_v28  ;;  %v1343_v49 = vadd.f32 %v3418_v24, %v1275_v21  ;;  %v1672_v53 = vmul.f32 %v2889_v5, %v734_v41 }
 0x17c   : > { %v1506_v36 = vadd.f32 %v1474_v51, %v1342_v61  ;;  %v1739_v7 = vmul.f32 %v2883_v1, %v4485_v30  ;;  %v1740_v17 = vmul.f32 %v2883_v1, %v4483_v18  ;;  %v4501_v28 = vrot.slane %v3477_v14, 7 }
 0x17d   : > { %v3875_v9 = vadd.f32 %v1051_v56, %v916_v15  ;;  %v4502_v38 = vrot.slane %v3463_v10, 7  ;;  %v1507_v24 = vadd.f32 %v3777_v35, %v1343_v49  ;;  %v4505_v18 = vrot.slane %v3477_v14, 1 }
 0x17e   : > { %v4504_v41 = vmov %v4501_v28  ;;  %v4506_v22 = vrot.slane %v3463_v10, 1  ;;  %v1703_v56 = vadd.f32 %v1671_v63, %v1506_v36  ;;  %v1903_v48 = vmul.f32 %v3185_v2, %v970_v20 }
 0x17f   : > { %v735_v15 = vsel %vm723_vm4, %v4502_v38, %v4501_v28  ;;  %v4503_v21 = vmov %v4502_v38  ;;  %v4508_v49 = vmov %v4505_v18  ;;  %v1704_v38 = vadd.f32 %v1672_v53, %v1507_v24 }
 0x180   : > { %v751_v51 = vsel %vm723_vm4, %v4504_v41, %v4503_v21  ;;  %v818_v30 = vmul.f32 %v2834_v34, %v735_v15  ;;  %v971_v29 = vsel %vm959_vm5, %v4506_v22, %v4505_v18  ;;  %v4507_v61 = vmov %v4506_v22 }
 0x181   : > { %v781_v35 = vsel %vm757_vm2, %v751_v51, 0.0  ;;  %v987_v28 = vsel %vm959_vm5, %v4508_v49, %v4507_v61  ;;  %v1771_v63 = vadd.f32 %v1739_v7, %v1703_v56  ;;  %v1904_v20 = vmul.f32 %v3185_v2, %v1015_v40 }
 0x182   : > { %v817_v21 = vmul.f32 %v2834_v34, %v781_v35  ;;  %v918_v41 = vadd.f32 %v3515_v55, %v818_v30  ;;  %v1017_v36 = vsel %vm993_vm3, %v987_v28, 0.0  ;;  %v1052_v51 = vmul.f32 %v2855_v42, %v971_v29  ;;  %v4509_v28 = vld [vmem:[#allocation35_spill] sm:$0xff] }
 0x183   : > { %v1053_v18 = vmul.f32 %v2855_v42, %v1017_v36  ;;  %v1772_v22 = vadd.f32 %v1740_v17, %v1704_v38  ;;  %v1276_v61 = vadd.f32 %v1244_v11, %v3766_v52  ;;  %v1277_v53 = vadd.f32 %v1245_v8, %v3769_v0 }
 0x184   : > { %v917_v12 = vadd.f32 %v3482_v13, %v817_v21  ;;  %v1477_v24 = vmul.f32 %v2887_v4, %v1015_v40  ;;  %v1935_v55 = vadd.f32 %v1903_v48, %v1771_v63  ;;  %v1246_v7 = vmul.f32 %v2885_v3, %v781_v35 }
 0x185   : > { %v3924_v30 = vadd.f32 %v1053_v18, %v918_v41  ;;  %v1936_v56 = vadd.f32 %v1904_v20, %v1772_v22  ;;  %v1344_v19 = vadd.f32 %v4509_v28, %v1276_v61  ;;  %v1345_v17 = vadd.f32 %v4510_v16, %v1277_v53 }
 0x186   : > { %v3927_v49 = vadd.f32 %v1052_v51, %v917_v12  ;;  %v1247_v13 = vmul.f32 %v2885_v3, %v735_v15  ;;  %v1478_v52 = vmul.f32 %v2887_v4, %v971_v29  ;;  %v1673_v0 = vmul.f32 %v2889_v5, %v781_v35 }
 0x187   : > { %v1674_v40 = vmul.f32 %v2889_v5, %v735_v15  ;;  %v1959_v11 = vpack.c.bf16 %v1936_v56, %v1935_v55  ;;  %v1508_v8 = vadd.f32 %v1476_v32, %v1344_v19  ;;  %v1509_v48 = vadd.f32 %v1477_v24, %v1345_v17 }
 0x188   : > { %v1741_v38 = vmul.f32 %v2883_v1, %v3463_v10  ;;  %v1742_v12 = vmul.f32 %v2883_v1, %v3477_v14  ;;  %v4511_v21 = vrot.slane %v3465_v44, 7  ;;  %v4512_v16 = vrot.slane %v3397_v59, 7 }
 0x189   : > { %v4515_v32 = vrot.slane %v3465_v44, 1  ;;  %v4516_v10 = vrot.slane %v3397_v59, 1  ;;  %2503 = vmatprep.mubr.bf16.mxu1 %v1959_v11  ;;  %v1705_v63 = vadd.f32 %v1673_v0, %v1508_v8  ;;  %v1706_v20 = vadd.f32 %v1674_v40, %v1509_v48 }
 0x18a   : > { %v736_v41 = vsel %vm723_vm4, %v4512_v16, %v4511_v21  ;;  %v4513_v35 = vmov %v4512_v16  ;;  %v4514_v15 = vmov %v4511_v21  ;;  %v1905_v22 = vmul.f32 %v3185_v2, %v971_v29 }
 0x18b   : > { %v752_v19 = vsel %vm723_vm4, %v4514_v15, %v4513_v35  ;;  %v972_v14 = vsel %vm959_vm5, %v4516_v10, %v4515_v32  ;;  %v820_v18 = vmul.f32 %v2834_v34, %v736_v41  ;;  %v1906_v61 = vmul.f32 %v3185_v2, %v1017_v36 }
 0x18c   : > { %v783_v51 = vsel %vm757_vm2, %v752_v19, 0.0  ;;  %v4517_v24 = vmov %v4516_v10  ;;  %v4518_v55 = vmov %v4515_v32  ;;  %v1773_v28 = vadd.f32 %v1741_v38, %v1705_v63  ;;  %v4519_v10 = vld [vmem:[#allocation11_spill] sm:$0xff] }
 0x18d   : > { %v819_v53 = vmul.f32 %v2834_v34, %v783_v51  ;;  %v988_v56 = vsel %vm959_vm5, %v4518_v55, %v4517_v24  ;;  %v1774_v17 = vadd.f32 %v1742_v12, %v1706_v20  ;;  %v920_v0 = vadd.f32 %v3492_v23, %v820_v18 }
 0x18e   : > { %v1019_v40 = vsel %vm993_vm3, %v988_v56, 0.0  ;;  %v1054_v11 = vmul.f32 %v2855_v42, %v972_v14  ;;  %v1278_v48 = vadd.f32 %v1246_v7, %v3870_v57  ;;  %v1479_v21 = vmul.f32 %v2887_v4, %v1017_v36 }
 0x18f   : > { %v919_v29 = vadd.f32 %v3426_v47, %v819_v53  ;;  %v1055_v8 = vmul.f32 %v2855_v42, %v1019_v40  ;;  %v1937_v16 = vadd.f32 %v1905_v22, %v1773_v28  ;;  %v1938_v35 = vadd.f32 %v1906_v61, %v1774_v17 }
 0x190   : > { %v1279_v38 = vadd.f32 %v1247_v13, %v3875_v9  ;;  %v1248_v15 = vmul.f32 %v2885_v3, %v783_v51  ;;  %v1346_v47 = vadd.f32 %v3487_v45, %v1278_v48  ;;  %v1249_v32 = vmul.f32 %v2885_v3, %v736_v41 }
 0x191   : > { %v3978_v12 = vadd.f32 %v1054_v11, %v919_v29  ;;  %v3980_v23 = vadd.f32 %v1055_v8, %v920_v0  ;;  %v1960_v19 = vpack.c.bf16 %v1938_v35, %v1937_v16  ;;  %v1480_v57 = vmul.f32 %v2887_v4, %v972_v14 }
 0x192   : > { %v1347_v63 = vadd.f32 %v4519_v10, %v1279_v38  ;;  %v1510_v36 = vadd.f32 %v1478_v52, %v1346_v47  ;;  %v1675_v7 = vmul.f32 %v2889_v5, %v783_v51  ;;  %v1676_v9 = vmul.f32 %v2889_v5, %v736_v41 }
 0x193   : > { %v1743_v13 = vmul.f32 %v2883_v1, %v3397_v59  ;;  %2504 = vmatmul.mubr.bf16.gmra.mrb[12].mxu1 %v1960_v19  ;;  %v1744_v45 = vmul.f32 %v2883_v1, %v3465_v44  ;;  %v4520_v18 = vrot.slane %v3658_v46, 7  ;;  %v4521_v22 = vrot.slane %v3639_v31, 7 }
 0x194   : > { %v1511_v20 = vadd.f32 %v1479_v21, %v1347_v63  ;;  %v1707_v59 = vadd.f32 %v1675_v7, %v1510_v36  ;;  %v4524_v24 = vrot.slane %v3658_v46, 1  ;;  %v4525_v55 = vrot.slane %v3639_v31, 1 }
 0x195   : > { %v737_v61 = vsel %vm723_vm4, %v4521_v22, %v4520_v18  ;;  %v4522_v52 = vmov %v4521_v22  ;;  %v4523_v51 = vmov %v4520_v18  ;;  %v1907_v17 = vmul.f32 %v3185_v2, %v972_v14  ;;  %v4529_v18 = vld [vmem:[#allocation18_spill] sm:$0xff] }
 0x196   : > { %v753_v41 = vsel %vm723_vm4, %v4523_v51, %v4522_v52  ;;  %v822_v44 = vmul.f32 %v2834_v34, %v737_v61  ;;  %v973_v56 = vsel %vm959_vm5, %v4525_v55, %v4524_v24  ;;  %v1708_v28 = vadd.f32 %v1676_v9, %v1511_v20  ;;  %v4528_v20 = vld [vmem:[#allocation14_spill] sm:$0xff] }
 0x197   : > { %v785_v53 = vsel %vm757_vm2, %v753_v41, 0.0  ;;  %v4526_v29 = vmov %v4525_v55  ;;  %v4527_v11 = vmov %v4524_v24  ;;  %v1775_v48 = vadd.f32 %v1743_v13, %v1707_v59 }
 0x198   : > { %v821_v0 = vmul.f32 %v2834_v34, %v785_v53  ;;  %v989_v8 = vsel %vm959_vm5, %v4527_v11, %v4526_v29  ;;  %v1908_v21 = vmul.f32 %v3185_v2, %v1019_v40  ;;  %v922_v16 = vadd.f32 %v3684_v26, %v822_v44 }
 0x199   : > { %v1021_v35 = vsel %vm993_vm3, %v989_v8, 0.0  ;;  %v1776_v38 = vadd.f32 %v1744_v45, %v1708_v28  ;;  %v1056_v47 = vmul.f32 %v2855_v42, %v973_v56  ;;  %v1481_v10 = vmul.f32 %v2887_v4, %v1019_v40 }
 0x19a   : > { %v921_v14 = vadd.f32 %v3656_v25, %v821_v0  ;;  %v1057_v19 = vmul.f32 %v2855_v42, %v1021_v35  ;;  %v1939_v63 = vadd.f32 %v1907_v17, %v1775_v48  ;;  %v1280_v36 = vadd.f32 %v1248_v15, %v3927_v49 }
 0x19b   : > { %v1281_v7 = vadd.f32 %v1249_v32, %v3924_v30  ;;  %v1940_v2 = vadd.f32 %v1908_v21, %v1776_v38  ;;  %v1250_v13 = vmul.f32 %v2885_v3, %v785_v53  ;;  %v1251_v25 = vmul.f32 %v2885_v3, %v737_v61 }
 0x19c   : > { %v4032_v9 = vadd.f32 %v1056_v47, %v921_v14  ;;  %v4034_v26 = vadd.f32 %v1057_v19, %v922_v16  ;;  %v1348_v45 = vadd.f32 %v4528_v20, %v1280_v36  ;;  %v1482_v40 = vmul.f32 %v2887_v4, %v973_v56  ;;  %v4079_v16 = vld [vmem:[%s4334_s3 + $0x8] ss:$0 sm:$0xff] }
 0x19d   : > { %v1349_v22 = vadd.f32 %v4529_v18, %v1281_v7  ;;  %v1961_v52 = vpack.c.bf16 %v1940_v2, %v1939_v63  ;;  %v1677_v49 = vmul.f32 %v2889_v5, %v785_v53  ;;  %v1678_v30 = vmul.f32 %v2889_v5, %v737_v61  ;;  %v4538_v2 = vld [vmem:[#allocation10_spill] sm:$0xff] }
 0x19e   : > { %v1745_v15 = vmul.f32 %v2883_v1, %v3639_v31  ;;  %v1512_v32 = vadd.f32 %v1480_v57, %v1348_v45  ;;  %v1746_v41 = vmul.f32 %v2883_v1, %v3658_v46  ;;  %v4530_v59 = vrot.slane %v3643_v50, 7 }
 0x19f   : > { %v1513_v51 = vadd.f32 %v1481_v10, %v1349_v22  ;;  %v4531_v44 = vrot.slane %v3557_v37, 7  ;;  %2507 = vmatprep.mubr.bf16.mxu1 %v1961_v52  ;;  %v4534_v55 = vrot.slane %v3643_v50, 1  ;;  %v4535_v46 = vrot.slane %v3557_v37, 1 }
 0x1a0   : > { %v4533_v61 = vmov %v4530_v59  ;;  %v1709_v11 = vadd.f32 %v1677_v49, %v1512_v32  ;;  %v1909_v38 = vmul.f32 %v4079_v16, %v973_v56  ;;  %v1910_v36 = vmul.f32 %v4079_v16, %v1021_v35  ;;  %v4539_v32 = vld [vmem:[#allocation12_spill] sm:$0xff] }
 0x1a1   : > { %v738_v24 = vsel %vm723_vm4, %v4531_v44, %v4530_v59  ;;  %v4532_v53 = vmov %v4531_v44  ;;  %v974_v28 = vsel %vm959_vm5, %v4535_v46, %v4534_v55  ;;  %v4536_v17 = vmov %v4535_v46 }
 0x1a2   : > { %v754_v31 = vsel %vm723_vm4, %v4533_v61, %v4532_v53  ;;  %v824_v57 = vmul.f32 %v2834_v34, %v738_v24  ;;  %v4537_v0 = vmov %v4534_v55  ;;  %v1710_v8 = vadd.f32 %v1678_v30, %v1513_v51 }
 0x1a3   : > { %v990_v29 = vsel %vm959_vm5, %v4537_v0, %v4536_v17  ;;  %v787_v48 = vsel %vm757_vm2, %v754_v31, 0.0  ;;  %v1777_v10 = vadd.f32 %v1745_v15, %v1709_v11  ;;  %v1058_v7 = vmul.f32 %v2855_v42, %v974_v28 }
 0x1a4   : > { %v1023_v21 = vsel %vm993_vm3, %v990_v29, 0.0  ;;  %v823_v14 = vmul.f32 %v2834_v34, %v787_v48  ;;  %v924_v47 = vadd.f32 %v3670_v54, %v824_v57  ;;  %v1778_v63 = vadd.f32 %v1746_v41, %v1710_v8  ;;  %v4540_v41 = vld [vmem:[#allocation20_spill] sm:$0xff] }
 0x1a5   : > { %v1059_v19 = vmul.f32 %v2855_v42, %v1023_v21  ;;  %v1282_v18 = vadd.f32 %v1250_v13, %v3978_v12  ;;  %v1283_v56 = vadd.f32 %v1251_v25, %v3980_v23  ;;  %v1483_v22 = vmul.f32 %v2887_v4, %v1021_v35 }
 0x1a6   : > { %v923_v20 = vadd.f32 %v4538_v2, %v823_v14  ;;  %v1941_v52 = vadd.f32 %v1909_v38, %v1777_v10  ;;  %v1942_v54 = vadd.f32 %v1910_v36, %v1778_v63  ;;  %v1252_v49 = vmul.f32 %v2885_v3, %v787_v48 }
 0x1a7   : > { %v4088_v45 = vadd.f32 %v1059_v19, %v924_v47  ;;  %v1253_v15 = vmul.f32 %v2885_v3, %v738_v24  ;;  %v1350_v51 = vadd.f32 %v4539_v32, %v1282_v18  ;;  %v1351_v59 = vadd.f32 %v4540_v41, %v1283_v56 }
 0x1a8   : > { %v1090_v30 = vadd.f32 %v1058_v7, %v923_v20  ;;  %v1962_v44 = vpack.c.bf16 %v1942_v54, %v1941_v52  ;;  %v1484_v53 = vmul.f32 %v2887_v4, %v974_v28  ;;  %v1679_v12 = vmul.f32 %v2889_v5, %v787_v48 }
 0x1a9   : > { %v1680_v23 = vmul.f32 %v2889_v5, %v738_v24  ;;  %v1514_v13 = vadd.f32 %v1482_v40, %v1350_v51  ;;  %v1515_v35 = vadd.f32 %v1483_v22, %v1351_v59  ;;  %v1747_v25 = vmul.f32 %v2883_v1, %v3557_v37  ;;  %v4549_v59 = vld [vmem:[#allocation16_spill] sm:$0xff] }
 0x1aa   : > { %v1748_v61 = vmul.f32 %v2883_v1, %v3643_v50  ;;  %2508 = vmatmul.mubr.bf16.gmra.mrb[16].mxu1 %v1962_v44  ;;  %v4541_v31 = vrot.slane %v3809_v60, 7  ;;  %v4542_v57 = vrot.slane %v3795_v6, 7  ;;  %v4545_v37 = vrot.slane %v3809_v60, 1  ;;  %v4550_v44 = vld [vmem:[#allocation15_spill] sm:$0xff] }
 0x1ab   : > { %v4546_v17 = vrot.slane %v3795_v6, 1  ;;  %v1711_v8 = vadd.f32 %v1679_v12, %v1514_v13  ;;  %v1712_v48 = vadd.f32 %v1680_v23, %v1515_v35  ;;  %v1911_v47 = vmul.f32 %v4079_v16, %v974_v28 }
 0x1ac   : > { %v739_v55 = vsel %vm723_vm4, %v4542_v57, %v4541_v31  ;;  %v4543_v46 = vmov %v4542_v57  ;;  %v4544_v24 = vmov %v4541_v31  ;;  %v4548_v29 = vmov %v4545_v37 }
 0x1ad   : > { %v755_v40 = vsel %vm723_vm4, %v4544_v24, %v4543_v46  ;;  %v975_v50 = vsel %vm959_vm5, %v4546_v17, %v4545_v37  ;;  %v4547_v0 = vmov %v4546_v17  ;;  %v826_v14 = vmul.f32 %v2834_v34, %v739_v55 }
 0x1ae   : > { %v991_v11 = vsel %vm959_vm5, %v4548_v29, %v4547_v0  ;;  %v789_v38 = vsel %vm757_vm2, %v755_v40, 0.0  ;;  %v1912_v19 = vmul.f32 %v4079_v16, %v1023_v21  ;;  %v1779_v36 = vadd.f32 %v1747_v25, %v1711_v8 }
 0x1af   : > { %v825_v10 = vmul.f32 %v2834_v34, %v789_v38  ;;  %v1025_v63 = vsel %vm993_vm3, %v991_v11, 0.0  ;;  %v1780_v7 = vadd.f32 %v1748_v61, %v1712_v48  ;;  %v926_v2 = vadd.f32 %v3853_v43, %v826_v14 }
 0x1b0   : > { %v1061_v20 = vmul.f32 %v2855_v42, %v1025_v63  ;;  %v1060_v56 = vmul.f32 %v2855_v42, %v975_v50  ;;  %v1284_v22 = vadd.f32 %v1252_v49, %v4032_v9  ;;  %v1285_v28 = vadd.f32 %v1253_v15, %v4034_v26 }
 0x1b1   : > { %v925_v18 = vadd.f32 %v3818_v58, %v825_v10  ;;  %v1943_v52 = vadd.f32 %v1911_v47, %v1779_v36  ;;  %v1944_v54 = vadd.f32 %v1912_v19, %v1780_v7  ;;  %v1254_v32 = vmul.f32 %v2885_v3, %v789_v38 }
 0x1b2   : > { %v1093_v34 = vadd.f32 %v1061_v20, %v926_v2  ;;  %v1485_v51 = vmul.f32 %v2887_v4, %v1023_v21  ;;  %v1352_v43 = vadd.f32 %v4549_v59, %v1284_v22  ;;  %v1353_v12 = vadd.f32 %v4550_v44, %v1285_v28  ;;  %v4561_v59 = vld [vmem:[#allocation21_spill] sm:$0xff] }
 0x1b3   : > { %v1092_v41 = vadd.f32 %v1060_v56, %v925_v18  ;;  %v1323_v58 = vmul.f32 %v2878_v62, %v3809_v60  ;;  %v1963_v42 = vpack.c.bf16 %v1944_v54, %v1943_v52  ;;  %v1255_v9 = vmul.f32 %v2885_v3, %v739_v55  ;;  %v4552_v62 = vld [vmem:[#allocation23_spill] sm:$0xff] }
 0x1b4   : > { %v1486_v26 = vmul.f32 %v2887_v4, %v975_v50  ;;  %v1516_v49 = vadd.f32 %v1484_v53, %v1352_v43  ;;  %v1517_v15 = vadd.f32 %v1485_v51, %v1353_v12  ;;  %v1681_v23 = vmul.f32 %v2889_v5, %v789_v38 }
 0x1b5   : > { %v1682_v13 = vmul.f32 %v2889_v5, %v739_v55  ;;  %2511 = vmatprep.mubr.bf16.mxu1 %v1963_v42  ;;  %v1487_v21 = vmul.f32 %v2887_v4, %v1025_v63  ;;  %v1749_v35 = vmul.f32 %v2883_v1, %v3795_v6  ;;  %v4551_v25 = vrot.slane %v3806_v39, 7  ;;  %v4554_v55 = vld [vmem:[#allocation13_spill] sm:$0xff]  ;;  %v4555_v6 = vld [vmem:[#allocation30_spill] sm:$0xff] }
 0x1b6   : > { %v4553_v61 = vrot.slane %v4552_v62, 7  ;;  %v1286_v57 = vadd.f32 %v1254_v32, %v1090_v30  ;;  %v1713_v53 = vadd.f32 %v1681_v23, %v1516_v49  ;;  %v1750_v24 = vmul.f32 %v2883_v1, %v3809_v60  ;;  %v4560_v32 = vld [vmem:[#allocation26_spill] sm:$0xff] }
 0x1b7   : > { %v1714_v46 = vadd.f32 %v1682_v13, %v1517_v15  ;;  %v1220_v40 = vsel %vm757_vm2, %v4554_v55, 0.0  ;;  %v1287_v37 = vadd.f32 %v1255_v9, %v4088_v45  ;;  %v4556_v0 = vrot.slane %v3806_v39, 1  ;;  %v4564_v42 = vld [vmem:[#allocation6_spill] sm:$0xff] }
 0x1b8   : > { %v1173_v31 = vsel %vm723_vm4, %v4553_v61, %v4551_v25  ;;  %v1354_v17 = vadd.f32 %v4555_v6, %v1286_v57  ;;  %v4557_v29 = vrot.slane %v4552_v62, 1  ;;  %v1781_v48 = vadd.f32 %v1749_v35, %v1713_v53  ;;  %v4566_v25 = vld [vmem:[#allocation7_spill] sm:$0xff]  ;;  %v4567_v61 = vld [vmem:[#allocation9_spill] sm:$0xff] }
 0x1b9   : > { %v4559_v8 = vmov %v4556_v0  ;;  %v1782_v38 = vadd.f32 %v1750_v24, %v1714_v46  ;;  %v1913_v45 = vmul.f32 %v4079_v16, %v975_v50  ;;  %v1914_v14 = vmul.f32 %v4079_v16, %v1025_v63 }
 0x1ba   : > { %v1405_v30 = vsel %vm959_vm5, %v4557_v29, %v4556_v0  ;;  %v4558_v11 = vmov %v4557_v29  ;;  %v1256_v47 = vmul.f32 %v2885_v3, %v1220_v40  ;;  %v1355_v19 = vadd.f32 %v1323_v58, %v1287_v37 }
 0x1bb   : > { %v1421_v60 = vsel %vm959_vm5, %v4559_v8, %v4558_v11  ;;  %v1518_v10 = vadd.f32 %v1486_v26, %v1354_v17  ;;  %v1683_v36 = vmul.f32 %v2889_v5, %v1220_v40  ;;  %v1945_v7 = vadd.f32 %v1913_v45, %v1781_v48  ;;  %v4565_v26 = vld [vmem:[#allocation22_spill] sm:$0xff] }
 0x1bc   : > { %v1946_v2 = vadd.f32 %v1914_v14, %v1782_v38  ;;  %v1257_v20 = vmul.f32 %v2885_v3, %v1173_v31  ;;  %v1453_v27 = vsel %vm993_vm3, %v1421_v60, 0.0  ;;  %v1519_v39 = vadd.f32 %v1487_v21, %v1355_v19  ;;  %v4562_v3 = vld [vmem:[#allocation8_spill] sm:$0xff] }
 0x1bd   : > { %v1684_v18 = vmul.f32 %v2889_v5, %v1173_v31  ;;  %v1715_v56 = vadd.f32 %v1683_v36, %v1518_v10  ;;  %v1288_v50 = vadd.f32 %v1256_v47, %v1092_v41  ;;  %v1488_v63 = vmul.f32 %v2887_v4, %v1405_v30  ;;  %v4563_v41 = vld [vmem:[#allocation17_spill] sm:$0xff] }
 0x1be   : > { %v1964_v22 = vpack.c.bf16 %v1946_v2, %v1945_v7  ;;  %v1915_v28 = vmul.f32 %v4079_v16, %v1405_v30  ;;  %v1289_v52 = vadd.f32 %v1257_v20, %v1093_v34  ;;  %v1685_v33 = vmul.f32 %v2889_v5, %v4562_v3 }
 0x1bf   : > { %v1716_v54 = vadd.f32 %v1684_v18, %v1519_v39  ;;  %v1783_v51 = vadd.f32 %v4560_v32, %v1715_v56  ;;  %v1356_v43 = vadd.f32 %v4561_v59, %v1288_v50  ;;  %v1489_v44 = vmul.f32 %v2887_v4, %v1453_v27 }
 0x1c0   : > { %2512 = vmatmul.mubr.bf16.gmra.mrb[20].mxu1 %v1964_v22  ;;  %v1916_v12 = vmul.f32 %v4079_v16, %v1453_v27  ;;  %v1357_v58 = vadd.f32 %v4563_v41, %v1289_v52  ;;  %v1686_v9 = vmul.f32 %v2889_v5, %v4564_v42  ;;  %v1753_v23 = vmul.f32 0.0, %v2883_v1  ;;  %v4209_v1 = vld [vmem:[%s4336_s5] ss:$0 sm:$0xff] }
 0x1c1   : > { %v1784_v34 = vadd.f32 %v4565_v26, %v1716_v54  ;;  %v1947_v49 = vadd.f32 %v1915_v28, %v1783_v51  ;;  %v1520_v15 = vadd.f32 %v1488_v63, %v1356_v43  ;;  %v1917_v4 = vmul.f32 %v4079_v16, %v4566_v25 }
 0x1c2   : > { %v1521_v13 = vadd.f32 %v1489_v44, %v1357_v58  ;;  %v1918_v31 = vmul.f32 %v4079_v16, %v4567_v61 }
 0x1c3   : > { %v1948_v21 = vadd.f32 %v1916_v12, %v1784_v34  ;;  %v1717_v35 = vadd.f32 %v1685_v33, %v1520_v15 }
 0x1c4   : > { %v1718_v62 = vadd.f32 %v1686_v9, %v1521_v13 }
 0x1c5   : > { %v1965_v57 = vpack.c.bf16 %v1948_v21, %v1947_v49  ;;  %v1785_v5 = vadd.f32 %v1753_v23, %v1717_v35 }
 0x1c6   : > { %v1786_v53 = vadd.f32 %v1753_v23, %v1718_v62 }
 0x1c7   : > { %2515 = vmatprep.mubr.bf16.mxu1 %v1965_v57  ;;  %v1949_v46 = vadd.f32 %v1917_v4, %v1785_v5 }
 0x1c8   : > { %v1950_v24 = vadd.f32 %v1918_v31, %v1786_v53 }
 0x1ca   : > { %v1966_v55 = vpack.c.bf16 %v1950_v24, %v1949_v46 }
 0x1cc   : > { %2516 = vmatmul.mubr.bf16.gmra.mrb[24].mxu1 %v1966_v55 }
 0x1f5   : > { %v2489_v40 = vpop.f32.mrb[32].mxu0 }
 0x1f6   : > { %v2081_v37 = vadd.f32 %v2489_v40, %v4209_v1  ;;  %v2072_v16 = vpop.f32.mrb[33].mxu0 }
 0x1f7   : > { %v2073_v6 = vadd.f32 %v4209_v1, %v2072_v16  ;;  %v2490_v17 = vpop.f32.mrb[34].mxu0 }
 0x1f8   : > { %v2201_v0 = vmax.f32 %v2081_v37, 0.0  ;;  %v2084_v29 = vadd.f32 %v2490_v17, %v4209_v1  ;;  %v2075_v30 = vpop.f32.mrb[35].mxu0 }
 0x1f9   : > { %v2199_v11 = vmax.f32 %v2073_v6, 0.0  ;;  %v2076_v8 = vadd.f32 %v4209_v1, %v2075_v30 }
 0x1fa   : > { %2233 = vst [vmem:[%s4217_s16 + $0x10] sm:$0xff] %v2201_v0  ;;  %v2202_v60 = vmax.f32 %v2084_v29, 0.0 }
 0x1fb   : > { %2231 = vst [vmem:[%s4217_s16] sm:$0xff] %v2199_v11  ;;  %v2200_v48 = vmax.f32 %v2076_v8, 0.0 }
 0x1fc   : > { %2234 = vst [vmem:[%s4217_s16 + $0x18] sm:$0xff] %v2202_v60 }
 0x1fd   : > { %2232 = vst [vmem:[%s4217_s16 + $0x8] sm:$0xff] %v2200_v48 }
 0x214   : > { %v2493_v38 = vpop.f32.mrb[0].mxu1 }
 0x215   : > { %v2097_v45 = vadd.f32 %v2493_v38, %v4209_v1  ;;  %v2088_v14 = vpop.f32.mrb[1].mxu1 }
 0x216   : > { %v2089_v47 = vadd.f32 %v4209_v1, %v2088_v14  ;;  %v2494_v19 = vpop.f32.mrb[2].mxu1 }
 0x217   : > { %v2205_v10 = vmax.f32 %v2097_v45, 0.0  ;;  %v2100_v36 = vadd.f32 %v2494_v19, %v4209_v1  ;;  %v2091_v7 = vpop.f32.mrb[3].mxu1 }
 0x218   : > { %v2203_v2 = vmax.f32 %v2089_v47, 0.0  ;;  %v2092_v20 = vadd.f32 %v4209_v1, %v2091_v7 }
 0x219   : > { %2237 = vst [vmem:[%s4217_s16 + $0x30] sm:$0xff] %v2205_v10  ;;  %v2206_v27 = vmax.f32 %v2100_v36, 0.0 }
 0x21a   : > { %2235 = vst [vmem:[%s4217_s16 + $0x20] sm:$0xff] %v2203_v2  ;;  %v2204_v39 = vmax.f32 %v2092_v20, 0.0 }
 0x21b   : > { %2238 = vst [vmem:[%s4217_s16 + $0x38] sm:$0xff] %v2206_v27 }
 0x21c   : > { %2236 = vst [vmem:[%s4217_s16 + $0x28] sm:$0xff] %v2204_v39 }
 0x232   : > { %v2497_v18 = vpop.f32.mrb[4].mxu1 }
 0x233   : > { %v2113_v56 = vadd.f32 %v2497_v18, %v4209_v1  ;;  %v2104_v50 = vpop.f32.mrb[5].mxu1 }
 0x234   : > { %v2105_v22 = vadd.f32 %v4209_v1, %v2104_v50  ;;  %v2498_v63 = vpop.f32.mrb[6].mxu1 }
 0x235   : > { %v2209_v28 = vmax.f32 %v2113_v56, 0.0  ;;  %v2116_v52 = vadd.f32 %v2498_v63, %v4209_v1  ;;  %v2107_v54 = vpop.f32.mrb[7].mxu1 }
 0x236   : > { %v2207_v32 = vmax.f32 %v2105_v22, 0.0  ;;  %v2108_v51 = vadd.f32 %v4209_v1, %v2107_v54 }
 0x237   : > { %2241 = vst [vmem:[%s4217_s16 + $0x50] sm:$0xff] %v2209_v28  ;;  %v2210_v59 = vmax.f32 %v2116_v52, 0.0 }
 0x238   : > { %2239 = vst [vmem:[%s4217_s16 + $0x40] sm:$0xff] %v2207_v32  ;;  %v2208_v43 = vmax.f32 %v2108_v51, 0.0 }
 0x239   : > { %2242 = vst [vmem:[%s4217_s16 + $0x58] sm:$0xff] %v2210_v59 }
 0x23a   : > { %2240 = vst [vmem:[%s4217_s16 + $0x48] sm:$0xff] %v2208_v43 }
 0x24c   : > { %v2501_v3 = vpop.f32.mrb[8].mxu1 }
 0x24d   : > { %v2129_v33 = vadd.f32 %v2501_v3, %v4209_v1  ;;  %v2120_v44 = vpop.f32.mrb[9].mxu1 }
 0x24e   : > { %v2121_v12 = vadd.f32 %v4209_v1, %v2120_v44  ;;  %v2502_v41 = vpop.f32.mrb[10].mxu1 }
 0x24f   : > { %v2213_v58 = vmax.f32 %v2129_v33, 0.0  ;;  %v2132_v42 = vadd.f32 %v2502_v41, %v4209_v1  ;;  %v2123_v9 = vpop.f32.mrb[11].mxu1 }
 0x250   : > { %v2211_v26 = vmax.f32 %v2121_v12, 0.0  ;;  %v2124_v34 = vadd.f32 %v4209_v1, %v2123_v9 }
 0x251   : > { %2245 = vst [vmem:[%s4217_s16 + $0x70] sm:$0xff] %v2213_v58  ;;  %v2214_v49 = vmax.f32 %v2132_v42, 0.0 }
 0x252   : > { %2243 = vst [vmem:[%s4217_s16 + $0x60] sm:$0xff] %v2211_v26  ;;  %v2212_v15 = vmax.f32 %v2124_v34, 0.0 }
 0x253   : > { %2246 = vst [vmem:[%s4217_s16 + $0x78] sm:$0xff] %v2214_v49 }
 0x254   : > { %2244 = vst [vmem:[%s4217_s16 + $0x68] sm:$0xff] %v2212_v15 }
 0x266   : > { %v2505_v23 = vpop.f32.mrb[12].mxu1 }
 0x267   : > { %v2145_v13 = vadd.f32 %v2505_v23, %v4209_v1  ;;  %v2136_v21 = vpop.f32.mrb[13].mxu1 }
 0x268   : > { %v2137_v35 = vadd.f32 %v4209_v1, %v2136_v21  ;;  %v2506_v25 = vpop.f32.mrb[14].mxu1 }
 0x269   : > { %v2217_v4 = vmax.f32 %v2145_v13, 0.0  ;;  %v2148_v62 = vadd.f32 %v2506_v25, %v4209_v1  ;;  %v2139_v61 = vpop.f32.mrb[15].mxu1 }
 0x26a   : > { %v2215_v31 = vmax.f32 %v2137_v35, 0.0  ;;  %v2140_v57 = vadd.f32 %v4209_v1, %v2139_v61 }
 0x26b   : > { %2249 = vst [vmem:[%s4217_s16 + $0x90] sm:$0xff] %v2217_v4  ;;  %v2218_v5 = vmax.f32 %v2148_v62, 0.0 }
 0x26c   : > { %2247 = vst [vmem:[%s4217_s16 + $0x80] sm:$0xff] %v2215_v31  ;;  %v2216_v53 = vmax.f32 %v2140_v57, 0.0 }
 0x26d   : > { %2250 = vst [vmem:[%s4217_s16 + $0x98] sm:$0xff] %v2218_v5 }
 0x26e   : > { %2248 = vst [vmem:[%s4217_s16 + $0x88] sm:$0xff] %v2216_v53 }
 0x27d   : > { %v2509_v46 = vpop.f32.mrb[16].mxu1 }
 0x27e   : > { %v2161_v24 = vadd.f32 %v2509_v46, %v4209_v1  ;;  %v2152_v55 = vpop.f32.mrb[17].mxu1 }
 0x27f   : > { %v2153_v40 = vadd.f32 %v4209_v1, %v2152_v55  ;;  %v2510_v37 = vpop.f32.mrb[18].mxu1 }
 0x280   : > { %v2221_v16 = vmax.f32 %v2161_v24, 0.0  ;;  %v2164_v6 = vadd.f32 %v2510_v37, %v4209_v1  ;;  %v2155_v17 = vpop.f32.mrb[19].mxu1 }
 0x281   : > { %v2219_v0 = vmax.f32 %v2153_v40, 0.0  ;;  %v2156_v29 = vadd.f32 %v4209_v1, %v2155_v17 }
 0x282   : > { %2253 = vst [vmem:[%s4217_s16 + $0xb0] sm:$0xff] %v2221_v16  ;;  %v2222_v30 = vmax.f32 %v2164_v6, 0.0 }
 0x283   : > { %2251 = vst [vmem:[%s4217_s16 + $0xa0] sm:$0xff] %v2219_v0  ;;  %v2220_v11 = vmax.f32 %v2156_v29, 0.0 }
 0x284   : > { %2254 = vst [vmem:[%s4217_s16 + $0xb8] sm:$0xff] %v2222_v30 }
 0x285   : > { %2252 = vst [vmem:[%s4217_s16 + $0xa8] sm:$0xff] %v2220_v11 }
 0x293   : > { %v2513_v8 = vpop.f32.mrb[20].mxu1 }
 0x294   : > { %v2177_v60 = vadd.f32 %v2513_v8, %v4209_v1  ;;  %v2168_v48 = vpop.f32.mrb[21].mxu1 }
 0x295   : > { %v2169_v38 = vadd.f32 %v4209_v1, %v2168_v48  ;;  %v2514_v45 = vpop.f32.mrb[22].mxu1 }
 0x296   : > { %v2225_v14 = vmax.f32 %v2177_v60, 0.0  ;;  %v2180_v47 = vadd.f32 %v2514_v45, %v4209_v1  ;;  %v2171_v19 = vpop.f32.mrb[23].mxu1 }
 0x297   : > { %v2223_v10 = vmax.f32 %v2169_v38, 0.0  ;;  %v2172_v36 = vadd.f32 %v4209_v1, %v2171_v19 }
 0x298   : > { %2257 = vst [vmem:[%s4217_s16 + $0xd0] sm:$0xff] %v2225_v14  ;;  %v2226_v7 = vmax.f32 %v2180_v47, 0.0 }
 0x299   : > { %2255 = vst [vmem:[%s4217_s16 + $0xc0] sm:$0xff] %v2223_v10  ;;  %v2224_v2 = vmax.f32 %v2172_v36, 0.0 }
 0x29a   : > { %2258 = vst [vmem:[%s4217_s16 + $0xd8] sm:$0xff] %v2226_v7 }
 0x29b   : > { %2256 = vst [vmem:[%s4217_s16 + $0xc8] sm:$0xff] %v2224_v2 }
 0x29f   : > { %v2517_v20 = vpop.f32.mrb[24].mxu1 }
 0x2a0   : > { %v2193_v27 = vadd.f32 %v2517_v20, %v4209_v1  ;;  %v2184_v39 = vpop.f32.mrb[25].mxu1 }
 0x2a1   : > { %v2185_v18 = vadd.f32 %v4209_v1, %v2184_v39  ;;  %v2518_v56 = vpop.f32.mrb[26].mxu1 }
 0x2a2   : > { %v2229_v50 = vmax.f32 %v2193_v27, 0.0  ;;  %v2196_v22 = vadd.f32 %v2518_v56, %v4209_v1  ;;  %v2187_v63 = vpop.f32.mrb[27].mxu1 }
 0x2a3   : > { %v2227_v28 = vmax.f32 %v2185_v18, 0.0  ;;  %v2188_v52 = vadd.f32 %v4209_v1, %v2187_v63 }
 0x2a4   : > { %2261 = vst [vmem:[%s4217_s16 + $0xf0] sm:$0xff] %v2229_v50  ;;  %v2230_v54 = vmax.f32 %v2196_v22, 0.0 }
 0x2a5   : > { %2259 = vst [vmem:[%s4217_s16 + $0xe0] sm:$0xff] %v2227_v28  ;;  %v2228_v32 = vmax.f32 %v2188_v52, 0.0 }
 0x2a6   : > { %2262 = vst [vmem:[%s4217_s16 + $0xf8] sm:$0xff] %v2230_v54 }
 0x2a7   : > { %2260 = vst [vmem:[%s4217_s16 + $0xe8] sm:$0xff] %v2228_v32 }
 0x2a8   : > { %2617 = shalt.err (!%p2614_p3)
}
 0x2a9   : > { %s2618_s11 = scalar_lea.hbm %s4281_s26, 4096  ;;  %s2622_s14 = scalar_lea.hbm %s4337_s6, 8192 }
 0x2aa   : > { %p2619_p4 = scmp.ne.s32.totalorder %s4281_s26, %s2618_s11  ;;  %p2623_p9 = scmp.lt.u32.totalorder %s4281_s26, %s4337_s6 }
 0x2ab   : > { %p2624_p10 = scmp.lt.u32.totalorder %s2622_s14, %s2618_s11  ;;  %p2626_p12 = scmp.lt.u32.totalorder %s2618_s11, %s4281_s26 }
 0x2ac   : > { %p2620_p7 = pnand %p2619_p4, %p2745_p5 }
 0x2ad   : > { %p2625_p11 = por %p2624_p10, %p2623_p9 }
 0x2ae   : > { %p2621_p8 = pneg %p2620_p7 }
 0x2af   : > { %p2627_p13 = por %p2626_p12, %p2625_p11 }
 0x2b1   : > { %p2628_p0 = pnand %p2627_p13, %p2621_p8 }
 0x2b3   : > { %2631 = shalt.err (!%p2628_p0)
}
 0x2b4   : > { %s2670_s17 = smov 128   ;;  %s2671_s19 = smov 8  }
 0x2b5   : > { %2536 = dma.vmem_to_hbm [thread:$0]  (%p2745_p5), %s4283_s18, 4096, %s4281_s26, %s4290_s25, %s2670_s17, %s2670_s17, %s2671_s19  }
 0x2b6 PF: > { %p2542_p1 = scmp.ge.s32.totalorder %s2666_s24, 2  ;;  %s2292_s20 = sand.u32 1, %s2654_s21  }
 0x2b7   : > { %s2293_s28 = scalar_lea.sflag [#allocation4], %s2292_s20 }
 0x2b8   : > { %p2539_p2 = pnand %p2542_p1, %p2749_p6 }
 0x2ba   : > { %2649 = dma.done.wait (!%p2539_p2), %s2293_s28, 4096  }
 0x2bb   : > { %2651 = vsyncadd (!%p2539_p2), %s2293_s28, 4294963200  ;;  %p16_p3 = scmp.ge.s32.totalorder %s2732_s27, 4   ;;  %s4568_s21 = smov %s2658_s22 }
 0x2bc   : > { %s4569_s22 = smov %s2662_s23  ;;  %s4570_s23 = smov %s2743_s30 }
 0x2bd   : > { %s4571_s24 = smov %s2732_s27  ;;  %18 = sbr.rel (!%p16_p3) target bundleno = 3 (0x3), region = 82 }
 0x2c4   :  { %2298 = vsyncpa [#allocation4], 1 }
 0x2c5   :  { %2300 = vsyncpa [#allocation4 + $0x1], 1 }

</bundles_post_ra>
